<compile_context>
chip_gen: v6e
topology: v6e:2x2x1
jax: 0.10.0
libtpu: 0.0.40
codegen_flags: <defaults>
</compile_context>

<pallas_src>
import numpy as np
import jax
import jax.numpy as jnp
from jax import lax
from jax.experimental import pallas as pl
from jax.experimental.pallas import tpu as pltpu

_SQRT_2_OVER_PI = np.float32(np.sqrt(2.0 / np.pi))
_GELU_C = np.float32(0.044715)


def _round_up(x, m):
    return (x + m - 1) // m * m


def _gelu_tanh(z):
    # tanh-approx GELU: transcendental goes to the EUP slot (erf would be a
    # VALU polynomial competing with the one-hot compare work).
    return 0.5 * z * (1.0 + jnp.tanh(_SQRT_2_OVER_PI * (z + _GELU_C * z * z * z)))


def gine_kernel(tile_of_ref, first_ref, last_ref,          # scalar-prefetch (SMEM)
                z_ref, ew_ref, dst_ref, xeps_ref,          # streamed edge/node tiles
                w1_ref, b1_ref, w2_ref, b2_ref,            # GIN-MLP params
                out_ref, acc_ref):
    t = pl.program_id(0)
    tN = acc_ref.shape[0]
    tE = ew_ref.shape[0]

    @pl.when(first_ref[t] != 0)
    def _init():
        acc_ref[...] = jnp.zeros_like(acc_ref)

    # message = gelu(x[src] + edge_emb) * edge_weight ; z precomputed per edge.
    msg = _gelu_tanh(z_ref[...]) * ew_ref[...]                       # (tE, Fp) f32

    # scatter_sum over dst into this group's node tile.  One-hot is built
    # pre-transposed (tN, tE) so the MXU matmul needs no XLU transpose.
    # Padded edges carry dst = -1 and edge_weight = 0, so they contribute 0.
    base = tile_of_ref[t] * tN
    node_ids = lax.broadcasted_iota(jnp.int32, (tN, tE), 0) + base
    onehot_t = (node_ids == dst_ref[...]).astype(jnp.bfloat16)       # exact 0/1
    acc_ref[...] += jnp.dot(onehot_t, msg.astype(jnp.bfloat16),
                            preferred_element_type=jnp.float32)

    # epilogue once per node tile (last edge tile of its group):
    # out = MLP((1 + eps) * x + aggregated), MLP = Linear -> ReLU -> Linear.
    @pl.when(last_ref[t] != 0)
    def _finalize():
        h = xeps_ref[...] + acc_ref[...]                              # (tN, Fp) f32
        h1 = jnp.dot(h.astype(jnp.bfloat16), w1_ref[...],
                     preferred_element_type=jnp.float32) + b1_ref[...]
        h1 = jnp.maximum(h1, 0.0)
        out = jnp.dot(h1.astype(jnp.bfloat16), w2_ref[...],
                      preferred_element_type=jnp.float32) + b2_ref[...]
        out_ref[...] = out.astype(out_ref.dtype)


def gine_conv_multi_edgeset(x, src, dst, edge_attr, edge_weight, params,
                            *, tile_nodes=256, tile_edges=512):
    """Eval-mode forward of GINEConvMultiEdgeset.

    x: (N, F) f32; src/dst: (E,) int32 (edge_index[0]/[1]); edge_attr: (E, A);
    edge_weight: (E, 1) or (E,); params: eps (1,), wb (A,F), bb (1,F),
    w1 (F,H), b1 (1,H), w2 (H,F), b2 (1,F).
    """
    N, F = x.shape
    E, A = edge_attr.shape
    H = params["w1"].shape[1]
    f32 = jnp.float32

    # Lane-dense padding of feature / hidden dims.
    Fp = _round_up(F, 128)
    Hp = _round_up(H, 128)

    # Tile sizes (clamped to the problem size).  tE must be a multiple of 128
    # (dst row lane width), tN a multiple of 8.
    tN = max(8, _round_up(min(tile_nodes, _round_up(N, 8)), 8))
    tE = max(128, _round_up(min(tile_edges, _round_up(E, 128)), 128))
    Np = _round_up(N, tN)
    G = Np // tN                                   # node tiles == dst groups

    src = src.astype(jnp.int32)
    dst = dst.astype(jnp.int32)
    ew = edge_weight.reshape(E, 1).astype(f32)
    eps = params["eps"].reshape(()).astype(f32)

    # ---- XLA-side precompute (all O(E*F) / O(N*F), done once) ----
    edge_emb = edge_attr.astype(f32) @ params["wb"].astype(f32) \
        + params["bb"].reshape(1, F).astype(f32)
    z_edges = jnp.take(x.astype(f32), src, axis=0) + edge_emb         # (E, F)

    # ---- group edges by destination node tile, pad each group to whole
    #      edge tiles (empty groups still get one all-dummy tile) ----
    g = dst // tN                                                      # (E,)
    order = jnp.argsort(g)
    g_s = g[order]
    dst_s = dst[order]
    ew_s = ew[order]
    z_s = z_edges[order]

    counts = jnp.zeros((G,), jnp.int32).at[g].add(1)
    grp_start = jnp.cumsum(counts) - counts                           # exclusive
    rt = jnp.maximum(1, (counts + tE - 1) // tE)                      # tiles/group
    tile_start = jnp.cumsum(rt) - rt                                  # exclusive

    # Static grid bound: every group wastes < 1 tile (+1 for empty groups).
    T = int(-(-E // tE) + G)
    Etot = T * tE

    rank = jnp.arange(E, dtype=jnp.int32) - grp_start[g_s]
    slot = tile_start[g_s] * tE + rank                                 # unique

    z_s_full = jnp.zeros((E, Fp), f32).at[:, :F].set(z_s)
    z_p = jnp.zeros((Etot, Fp), f32).at[slot].set(z_s_full)
    ew_p = jnp.zeros((Etot, 1), f32).at[slot].set(ew_s)
    dst_p = jnp.full((Etot,), -1, jnp.int32).at[slot].set(dst_s).reshape(1, Etot)

    tile_of = jnp.minimum(
        jnp.searchsorted(jnp.cumsum(rt), jnp.arange(T, dtype=jnp.int32),
                         side="right"),
        G - 1).astype(jnp.int32)
    change = tile_of[1:] != tile_of[:-1]
    first = jnp.concatenate(
        [jnp.ones((1,), dtype=jnp.bool_), change]).astype(jnp.int32)
    last = jnp.concatenate(
        [change, jnp.ones((1,), dtype=jnp.bool_)]).astype(jnp.int32)

    # (1 + eps) * x folded into the epilogue input; padded rows/cols stay zero.
    xeps_p = jnp.zeros((Np, Fp), f32).at[:N, :F].set((1.0 + eps) * x.astype(f32))

    # GIN-MLP weights: bf16 for single-pass MXU matmuls, biases in f32.
    w1 = jnp.zeros((Fp, Hp), jnp.bfloat16).at[:F, :H].set(
        params["w1"].astype(jnp.bfloat16))
    b1 = jnp.zeros((1, Hp), f32).at[:, :H].set(params["b1"].reshape(1, H))
    w2 = jnp.zeros((Hp, Fp), jnp.bfloat16).at[:H, :F].set(
        params["w2"].astype(jnp.bfloat16))
    b2 = jnp.zeros((1, Fp), f32).at[:, :F].set(params["b2"].reshape(1, F))

    # ---- BlockSpecs (index maps get the 3 scalar-prefetch refs positionally) ----
    def emap(t, tile_of_ref, first_ref, last_ref):
        return (t, 0)

    def emap_row(t, tile_of_ref, first_ref, last_ref):
        return (0, t)

    def nmap(t, tile_of_ref, first_ref, last_ref):
        return (tile_of_ref[t], 0)

    def cmap(t, tile_of_ref, first_ref, last_ref):
        return (0, 0)

    in_specs = [
        pl.BlockSpec((tE, Fp), emap),       # z = x[src] + edge_emb (edge tile)
        pl.BlockSpec((tE, 1), emap),        # edge_weight tile
        pl.BlockSpec((1, tE), emap_row),    # dst row tile
        pl.BlockSpec((tN, Fp), nmap),       # (1+eps)*x node tile (epilogue)
        pl.BlockSpec((Fp, Hp), cmap),       # mlp w1 (bf16)
        pl.BlockSpec((1, Hp), cmap),        # mlp b1
        pl.BlockSpec((Hp, Fp), cmap),       # mlp w2 (bf16)
        pl.BlockSpec((1, Fp), cmap),        # mlp b2
    ]
    out_spec = pl.BlockSpec((tN, Fp), nmap)

    # Rough VMEM budget (double-buffered streamed blocks + weights + scratch +
    # in-kernel intermediates); capped well below the 64 MiB/TC of v7x.
    est = (2 * (tE * Fp * 4 + tE * 4 + tE * 4)        # z / ew / dst blocks
           + 2 * tN * Fp * 4                          # x node tile
           + 2 * (Fp * Hp * 2 + Hp * 4 + Hp * Fp * 2 + Fp * 4)
           + 2 * tN * Fp * 4                          # output block
           + tN * Fp * 4                              # accumulator scratch
           + tN * tE * 4                              # iota / one-hot intermediates
           + 2 * tE * Fp * 4)                         # msg intermediates
    vmem_limit = int(min(48 * 1024 * 1024, max(16 * 1024 * 1024, 2 * est)))

    out_padded = pl.pallas_call(
        gine_kernel,
        out_shape=jax.ShapeDtypeStruct((Np, Fp), x.dtype),
        grid_spec=pltpu.PrefetchScalarGridSpec(
            num_scalar_prefetch=3,
            grid=(T,),
            in_specs=in_specs,
            out_specs=out_spec,
            scratch_shapes=[pltpu.VMEM((tN, Fp), jnp.float32)],
        ),
        compiler_params=pltpu.CompilerParams(
            dimension_semantics=("arbitrary",),
            vmem_limit_bytes=vmem_limit,
        ),
    )(tile_of, first, last, z_p, ew_p, dst_p, xeps_p, w1, b1, w2, b2)

    return out_padded[:N, :F]


def ref_forward(x, src, dst, edge_attr, edge_weight, p):
    """Pure-JAX f32 reference of the eval-mode PyTorch forward (exact erf GELU)."""
    eemb = edge_attr @ p["wb"] + p["bb"]
    z = x[src] + eemb
    msg = 0.5 * z * (1.0 + lax.erf(z / np.sqrt(2.0)))
    msg = msg * edge_weight
    agg = jax.ops.segment_sum(msg, dst, num_segments=x.shape[0])
    h = (1.0 + p["eps"][0]) * x + agg
    h1 = jnp.maximum(h @ p["w1"] + p["b1"], 0.0)
    return h1 @ p["w2"] + p["b2"]


if __name__ == "__main__":
    N, F, E, A, H = 128, 32, 256, 8, 64   # nodes, feat, edges, edge-attr dim, mlp hidden

    key = jax.random.PRNGKey(0)
    ks = jax.random.split(key, 11)

    x = jax.random.normal(ks[0], (N, F), dtype=jnp.float32)
    src = jax.random.randint(ks[1], (E,), 0, N, dtype=jnp.int32)   # edge_index[0]
    dst = jax.random.randint(ks[2], (E,), 0, N, dtype=jnp.int32)   # edge_index[1]
    edge_attr = jax.random.normal(ks[3], (E, A), dtype=jnp.float32)
    edge_weight = jax.random.uniform(ks[4], (E, 1), dtype=jnp.float32)

    params = {
        "eps": jnp.zeros((1,), dtype=jnp.float32),           # nn.Parameter([0.0])
        "wb": jax.random.normal(ks[5], (A, F), jnp.float32) * 0.1,
        "bb": jax.random.normal(ks[6], (1, F), jnp.float32) * 0.1,
        "w1": jax.random.normal(ks[7], (F, H), jnp.float32) * 0.1,
        "b1": jax.random.normal(ks[8], (1, H), jnp.float32) * 0.1,
        "w2": jax.random.normal(ks[9], (H, F), jnp.float32) * 0.1,
        "b2": jax.random.normal(ks[10], (1, F), jnp.float32) * 0.1,
    }

    out = gine_conv_multi_edgeset(x, src, dst, edge_attr, edge_weight, params,
                                  tile_nodes=256, tile_edges=512)
    out = jax.block_until_ready(out)

    ref = jax.block_until_ready(
        ref_forward(x, src, dst, edge_attr, edge_weight, params))

    # Kernel uses tanh-approx GELU and bf16 MXU matmuls (f32 accumulation), so
    # compare against the exact-erf f32 reference at bf16-level tolerance.
    np.testing.assert_allclose(np.asarray(out), np.asarray(ref),
                               rtol=3e-2, atol=3e-2)

    print("KERNEL_OK")
</pallas_src>

<mosaic_0001>
module attributes {stable_mosaic.version = 11 : i64} {
  func.func @gine_kernel(%arg0: i32, %arg1: memref<2xi32, #tpu.memory_space<smem>>, %arg2: memref<2xi32, #tpu.memory_space<smem>>, %arg3: memref<2xi32, #tpu.memory_space<smem>>, %arg4: memref<256x128xf32, #tpu.memory_space<vmem>>, %arg5: memref<256x1xf32, #tpu.memory_space<vmem>>, %arg6: memref<1x256xi32, #tpu.memory_space<vmem>>, %arg7: memref<128x128xf32, #tpu.memory_space<vmem>>, %arg8: memref<128x128xbf16, #tpu.memory_space<vmem>>, %arg9: memref<1x128xf32, #tpu.memory_space<vmem>>, %arg10: memref<128x128xbf16, #tpu.memory_space<vmem>>, %arg11: memref<1x128xf32, #tpu.memory_space<vmem>>, %arg12: memref<128x128xf32, #tpu.memory_space<vmem>>, %arg13: memref<128x128xf32, #tpu.memory_space<vmem>>) attributes {dimension_semantics = [#tpu.dimension_semantics<arbitrary>], iteration_bounds = array<i64: 2>, scalar_prefetch = 3 : i64, scratch_operands = 1 : i64, tpu.core_type = #tpu.core_type<tc>, window_params = [{transform_indices = @transform_0, window_bounds = array<i64: 256, 128>}, {transform_indices = @transform_1, window_bounds = array<i64: 256, 1>}, {transform_indices = @transform_2, window_bounds = array<i64: 1, 256>}, {transform_indices = @transform_3, window_bounds = array<i64: 128, 128>}, {pipeline_mode = #tpu.pipeline_mode<synchronous>, transform_indices = @transform_4, window_bounds = array<i64: 128, 128>}, {pipeline_mode = #tpu.pipeline_mode<synchronous>, transform_indices = @transform_5, window_bounds = array<i64: 1, 128>}, {pipeline_mode = #tpu.pipeline_mode<synchronous>, transform_indices = @transform_6, window_bounds = array<i64: 128, 128>}, {pipeline_mode = #tpu.pipeline_mode<synchronous>, transform_indices = @transform_7, window_bounds = array<i64: 1, 128>}, {transform_indices = @transform_8, window_bounds = array<i64: 128, 128>}]} {
    %0 = arith.index_cast %arg0 : i32 to index
    %1 = memref.load %arg2[%0] : memref<2xi32, #tpu.memory_space<smem>>
    %c0_i32 = arith.constant 0 : i32
    %2 = arith.cmpi ne, %1, %c0_i32 : i32
    %3 = arith.extui %2 : i1 to i32
    %c0_i32_0 = arith.constant 0 : i32
    %4 = arith.cmpi ne, %3, %c0_i32_0 : i32
    scf.if %4 {
      %cst_16 = arith.constant 0.000000e+00 : f32
      %44 = vector.broadcast %cst_16 : f32 to vector<128x128xf32>
      %c0_17 = arith.constant 0 : index
      %c0_18 = arith.constant 0 : index
      %45 = vector.load %arg13[%c0_17, %c0_18] : memref<128x128xf32, #tpu.memory_space<vmem>>, vector<128x128xf32>
      tpu.vector_store %arg13[%c0_17, %c0_18], %44 {strides = array<i32>} : memref<128x128xf32, #tpu.memory_space<vmem>>, vector<128x128xf32>,
    } else {
    }
    %c0 = arith.constant 0 : index
    %c0_1 = arith.constant 0 : index
    %5 = vector.load %arg4[%c0, %c0_1] : memref<256x128xf32, #tpu.memory_space<vmem>>, vector<256x128xf32>
    %cst = arith.constant 5.000000e-01 : f32
    %6 = vector.broadcast %cst : f32 to vector<256x128xf32>
    %7 = arith.mulf %6, %5 : vector<256x128xf32>
    %cst_2 = arith.constant 4.471500e-02 : f32
    %8 = vector.broadcast %cst_2 : f32 to vector<256x128xf32>
    %9 = arith.mulf %8, %5 : vector<256x128xf32>
    %10 = arith.mulf %9, %5 : vector<256x128xf32>
    %11 = arith.mulf %10, %5 : vector<256x128xf32>
    %12 = arith.addf %5, %11 : vector<256x128xf32>
    %cst_3 = arith.constant 0.797884583 : f32
    %13 = vector.broadcast %cst_3 : f32 to vector<256x128xf32>
    %14 = arith.mulf %13, %12 : vector<256x128xf32>
    %15 = math.tanh %14 : vector<256x128xf32>
    %cst_4 = arith.constant 1.000000e+00 : f32
    %16 = vector.broadcast %cst_4 : f32 to vector<256x128xf32>
    %17 = arith.addf %16, %15 : vector<256x128xf32>
    %18 = arith.mulf %7, %17 : vector<256x128xf32>
    %c0_5 = arith.constant 0 : index
    %c0_6 = arith.constant 0 : index
    %19 = vector.load %arg5[%c0_5, %c0_6] : memref<256x1xf32, #tpu.memory_space<vmem>>, vector<256x1xf32>
    %20 = vector.broadcast %19 : vector<256x1xf32> to vector<256x128xf32>
    %21 = arith.mulf %18, %20 : vector<256x128xf32>
    %22 = arith.index_cast %arg0 : i32 to index
    %23 = memref.load %arg1[%22] : memref<2xi32, #tpu.memory_space<smem>>
    %c128_i32 = arith.constant 128 : i32
    %24 = arith.muli %23, %c128_i32 : i32
    %25 = tpu.iota {dimensions = array<i32: 0>} : vector<128x256xi32>
    %26 = vector.broadcast %24 : i32 to vector<128x256xi32>
    %27 = arith.addi %25, %26 : vector<128x256xi32>
    %c0_7 = arith.constant 0 : index
    %c0_8 = arith.constant 0 : index
    %28 = vector.load %arg6[%c0_7, %c0_8] : memref<1x256xi32, #tpu.memory_space<vmem>>, vector<1x256xi32>
    %29 = vector.broadcast %28 : vector<1x256xi32> to vector<128x256xi32>
    %30 = arith.cmpi eq, %27, %29 : vector<128x256xi32>
    %31 = arith.extui %30 : vector<128x256xi1> to vector<128x256xi32>
    %32 = arith.sitofp %31 : vector<128x256xi32> to vector<128x256xf32>
    %33 = arith.truncf %32 : vector<128x256xf32> to vector<128x256xbf16>
    %c0_9 = arith.constant 0 : index
    %c0_10 = arith.constant 0 : index
    %34 = vector.load %arg13[%c0_9, %c0_10] : memref<128x128xf32, #tpu.memory_space<vmem>>, vector<128x128xf32>
    %35 = arith.truncf %21 : vector<256x128xf32> to vector<256x128xbf16>
    %cst_11 = arith.constant dense<0.000000e+00> : vector<128x128xf32>
    %36 = tpu.matmul %33, %35, %cst_11 {dimension_numbers = #tpu.dot_dimension_numbers<[1], [0], [0], [1], [0, 0, 1, 1], [], []>} : vector<128x256xbf16>, vector<256x128xbf16>, vector<128x128xf32> -> vector<128x128xf32>
    %37 = arith.addf %34, %36 : vector<128x128xf32>
    %c0_12 = arith.constant 0 : index
    %c0_13 = arith.constant 0 : index
    %38 = vector.load %arg13[%c0_12, %c0_13] : memref<128x128xf32, #tpu.memory_space<vmem>>, vector<128x128xf32>
    tpu.vector_store %arg13[%c0_12, %c0_13], %37 {strides = array<i32>} : memref<128x128xf32, #tpu.memory_space<vmem>>, vector<128x128xf32>,
    %39 = arith.index_cast %arg0 : i32 to index
    %40 = memref.load %arg3[%39] : memref<2xi32, #tpu.memory_space<smem>>
    %c0_i32_14 = arith.constant 0 : i32
    %41 = arith.cmpi ne, %40, %c0_i32_14 : i32
    %42 = arith.extui %41 : i1 to i32
    %c0_i32_15 = arith.constant 0 : i32
    %43 = arith.cmpi ne, %42, %c0_i32_15 : i32
    scf.if %43 {
      %c0_16 = arith.constant 0 : index
      %c0_17 = arith.constant 0 : index
      %44 = vector.load %arg7[%c0_16, %c0_17] : memref<128x128xf32, #tpu.memory_space<vmem>>, vector<128x128xf32>
      %c0_18 = arith.constant 0 : index
      %c0_19 = arith.constant 0 : index
      %45 = vector.load %arg13[%c0_18, %c0_19] : memref<128x128xf32, #tpu.memory_space<vmem>>, vector<128x128xf32>
      %46 = arith.addf %44, %45 : vector<128x128xf32>
      %47 = arith.truncf %46 : vector<128x128xf32> to vector<128x128xbf16>
      %c0_20 = arith.constant 0 : index
      %c0_21 = arith.constant 0 : index
      %48 = vector.load %arg8[%c0_20, %c0_21] : memref<128x128xbf16, #tpu.memory_space<vmem>>, vector<128x128xbf16>
      %cst_22 = arith.constant dense<0.000000e+00> : vector<128x128xf32>
      %49 = tpu.matmul %47, %48, %cst_22 {dimension_numbers = #tpu.dot_dimension_numbers<[1], [0], [0], [1], [0, 0, 1, 1], [], []>} : vector<128x128xbf16>, vector<128x128xbf16>, vector<128x128xf32> -> vector<128x128xf32>
      %c0_23 = arith.constant 0 : index
      %c0_24 = arith.constant 0 : index
      %50 = vector.load %arg9[%c0_23, %c0_24] : memref<1x128xf32, #tpu.memory_space<vmem>>, vector<1x128xf32>
      %51 = vector.broadcast %50 : vector<1x128xf32> to vector<128x128xf32>
      %52 = arith.addf %49, %51 : vector<128x128xf32>
      %cst_25 = arith.constant 0.000000e+00 : f32
      %53 = vector.broadcast %cst_25 : f32 to vector<128x128xf32>
      %54 = arith.maximumf %52, %53 : vector<128x128xf32>
      %55 = arith.truncf %54 : vector<128x128xf32> to vector<128x128xbf16>
      %c0_26 = arith.constant 0 : index
      %c0_27 = arith.constant 0 : index
      %56 = vector.load %arg10[%c0_26, %c0_27] : memref<128x128xbf16, #tpu.memory_space<vmem>>, vector<128x128xbf16>
      %cst_28 = arith.constant dense<0.000000e+00> : vector<128x128xf32>
      %57 = tpu.matmul %55, %56, %cst_28 {dimension_numbers = #tpu.dot_dimension_numbers<[1], [0], [0], [1], [0, 0, 1, 1], [], []>} : vector<128x128xbf16>, vector<128x128xbf16>, vector<128x128xf32> -> vector<128x128xf32>
      %c0_29 = arith.constant 0 : index
      %c0_30 = arith.constant 0 : index
      %58 = vector.load %arg11[%c0_29, %c0_30] : memref<1x128xf32, #tpu.memory_space<vmem>>, vector<1x128xf32>
      %59 = vector.broadcast %58 : vector<1x128xf32> to vector<128x128xf32>
      %60 = arith.addf %57, %59 : vector<128x128xf32>
      %c0_31 = arith.constant 0 : index
      %c0_32 = arith.constant 0 : index
      %61 = vector.load %arg12[%c0_31, %c0_32] : memref<128x128xf32, #tpu.memory_space<vmem>>, vector<128x128xf32>
      tpu.vector_store %arg12[%c0_31, %c0_32], %60 {strides = array<i32>} : memref<128x128xf32, #tpu.memory_space<vmem>>, vector<128x128xf32>,
    } else {
    }
    return
  }
  func.func @transform_0(%arg0: i32, %arg1: memref<2xi32, #tpu.memory_space<smem>>, %arg2: memref<2xi32, #tpu.memory_space<smem>>, %arg3: memref<2xi32, #tpu.memory_space<smem>>) -> (i32, i32) {
    %c0_i32 = arith.constant 0 : i32
    %c0_i32_0 = arith.constant 0 : i32
    return %arg0, %c0_i32 : i32, i32
  }
  func.func @transform_1(%arg0: i32, %arg1: memref<2xi32, #tpu.memory_space<smem>>, %arg2: memref<2xi32, #tpu.memory_space<smem>>, %arg3: memref<2xi32, #tpu.memory_space<smem>>) -> (i32, i32) {
    %c0_i32 = arith.constant 0 : i32
    %c0_i32_0 = arith.constant 0 : i32
    return %arg0, %c0_i32 : i32, i32
  }
  func.func @transform_2(%arg0: i32, %arg1: memref<2xi32, #tpu.memory_space<smem>>, %arg2: memref<2xi32, #tpu.memory_space<smem>>, %arg3: memref<2xi32, #tpu.memory_space<smem>>) -> (i32, i32) {
    %c0_i32 = arith.constant 0 : i32
    %c0_i32_0 = arith.constant 0 : i32
    return %c0_i32, %arg0 : i32, i32
  }
  func.func @transform_3(%arg0: i32, %arg1: memref<2xi32, #tpu.memory_space<smem>>, %arg2: memref<2xi32, #tpu.memory_space<smem>>, %arg3: memref<2xi32, #tpu.memory_space<smem>>) -> (i32, i32) {
    %0 = arith.index_cast %arg0 : i32 to index
    %1 = memref.load %arg1[%0] : memref<2xi32, #tpu.memory_space<smem>>
    %c0_i32 = arith.constant 0 : i32
    %c0_i32_0 = arith.constant 0 : i32
    return %1, %c0_i32 : i32, i32
  }
  func.func @transform_4(%arg0: i32, %arg1: memref<2xi32, #tpu.memory_space<smem>>, %arg2: memref<2xi32, #tpu.memory_space<smem>>, %arg3: memref<2xi32, #tpu.memory_space<smem>>) -> (i32, i32) {
    %c0_i32 = arith.constant 0 : i32
    %c0_i32_0 = arith.constant 0 : i32
    %c0_i32_1 = arith.constant 0 : i32
    return %c0_i32, %c0_i32_0 : i32, i32
  }
  func.func @transform_5(%arg0: i32, %arg1: memref<2xi32, #tpu.memory_space<smem>>, %arg2: memref<2xi32, #tpu.memory_space<smem>>, %arg3: memref<2xi32, #tpu.memory_space<smem>>) -> (i32, i32) {
    %c0_i32 = arith.constant 0 : i32
    %c0_i32_0 = arith.constant 0 : i32
    %c0_i32_1 = arith.constant 0 : i32
    return %c0_i32, %c0_i32_0 : i32, i32
  }
  func.func @transform_6(%arg0: i32, %arg1: memref<2xi32, #tpu.memory_space<smem>>, %arg2: memref<2xi32, #tpu.memory_space<smem>>, %arg3: memref<2xi32, #tpu.memory_space<smem>>) -> (i32, i32) {
    %c0_i32 = arith.constant 0 : i32
    %c0_i32_0 = arith.constant 0 : i32
    %c0_i32_1 = arith.constant 0 : i32
    return %c0_i32, %c0_i32_0 : i32, i32
  }
  func.func @transform_7(%arg0: i32, %arg1: memref<2xi32, #tpu.memory_space<smem>>, %arg2: memref<2xi32, #tpu.memory_space<smem>>, %arg3: memref<2xi32, #tpu.memory_space<smem>>) -> (i32, i32) {
    %c0_i32 = arith.constant 0 : i32
    %c0_i32_0 = arith.constant 0 : i32
    %c0_i32_1 = arith.constant 0 : i32
    return %c0_i32, %c0_i32_0 : i32, i32
  }
  func.func @transform_8(%arg0: i32, %arg1: memref<2xi32, #tpu.memory_space<smem>>, %arg2: memref<2xi32, #tpu.memory_space<smem>>, %arg3: memref<2xi32, #tpu.memory_space<smem>>) -> (i32, i32) {
    %0 = arith.index_cast %arg0 : i32 to index
    %1 = memref.load %arg1[%0] : memref<2xi32, #tpu.memory_space<smem>>
    %c0_i32 = arith.constant 0 : i32
    %c0_i32_0 = arith.constant 0 : i32
    return %1, %c0_i32 : i32, i32
  }
}

</mosaic_0001>

<bundles_post_ra>
// kernel: tpu_custom_call.1
= control target key start
LH: loop header
LB: loop body
LE: loop exit
PB: predicated region body
PF: predicated region fallthrough
CT: control target
= control target key end

     0   :  { %s3516_s0 = inlined_call_operand.vmem [shape: s32[2], index: 0, kind: input, shape index: {}]   ;;  %s3517_s3 = inlined_call_operand.vmem [shape: f32[512,128], index: 3, kind: input, shape index: {}]   ;;  %s3518_s4 = inlined_call_operand.vmem [shape: f32[512,1], index: 4, kind: input, shape index: {}]   ;;  %s3519_s5 = inlined_call_operand.vmem [shape: s32[1,512], index: 5, kind: input, shape index: {}]   ;;  %s3520_s6 = inlined_call_operand.hbm [shape: f32[128,128], index: 6, kind: input, shape index: {}]   ;;  %s3521_s7 = inlined_call_operand.hbm [shape: bf16[128,128], index: 7, kind: input, shape index: {}]   ;;  %s3522_s8 = inlined_call_operand.vmem [shape: f32[1,128], index: 8, kind: input, shape index: {}]   ;;  %s3523_s9 = inlined_call_operand.hbm [shape: bf16[128,128], index: 9, kind: input, shape index: {}]   ;;  %s3524_s10 = inlined_call_operand.vmem [shape: f32[1,128], index: 10, kind: input, shape index: {}]   ;;  %s3525_s11 = inlined_call_operand.hbm [shape: f32[128,128], index: 11, kind: output, shape index: {}]   ;;  %s3526_s1 = inlined_call_operand.vmem [shape: s32[2], index: 1, kind: input, shape index: {}]   ;;  %s3527_s2 = inlined_call_operand.vmem [shape: s32[2], index: 2, kind: input, shape index: {}]  }
   0x1   :  { %3543 = sst [smem:[#allocation29_spill]] %s3521_s7  ;;  %s16_s19 = sshll.u32 %s3516_s0, 4  ;;  %s17_s19 = int_to_ptr.vmem [resolvable:$true] %s16_s19 }
   0x2   :  { %3544 = sst [smem:[#allocation30_spill]] %s3523_s9  ;;  %s20_s22 = sshll.u32 %s3526_s1, 4  ;;  %s21_s22 = int_to_ptr.vmem [resolvable:$true] %s20_s22 }
   0x3   :  { %s2380_s23 = scalar_lea.vmem %s17_s19, 16  ;;  %p2385_p1 = scmp.lt.s32.totalorder %s17_s19, %s17_s19 }
   0x4   :  { %p2381_p0 = scmp.ne.s32.totalorder %s17_s19, %s2380_s23  ;;  %p2386_p2 = scmp.lt.s32.totalorder %s2380_s23, %s2380_s23 }
   0x6   :  { %p2387_p3 = por %p2386_p2, %p2385_p1 }
   0x8   :  { %p2388_p4 = pnand %p2387_p3, %p2381_p0 }
   0xa   :  { %2391 = shalt.err (!%p2388_p4)  }
   0xb   :  { %s2592_s24 = smov [#allocation4]   ;;  %s2392_s25 = scalar_lea.vmem %s21_s22, 16 }
   0xc   :  { %19 = dma.vmem_to_smem %s17_s19, 16, %s2592_s24, [#allocation3] }
   0xd   :  { %p2393_p5 = scmp.ne.s32.totalorder %s21_s22, %s2392_s25  ;;  %p2397_p6 = scmp.lt.s32.totalorder %s21_s22, %s21_s22 }
   0xe   :  { %p2398_p7 = scmp.lt.s32.totalorder %s2392_s25, %s2392_s25 }
  0x10   :  { %p2399_p8 = por %p2398_p7, %p2397_p6 }
  0x12   :  { %p2400_p9 = pnand %p2399_p8, %p2393_p5 }
  0x14   :  { %2403 = shalt.err (!%p2400_p9)  }
  0x15   :  { %s2593_s0 = smov [#allocation5]   ;;  %s24_s27 = sshll.u32 %s3527_s2, 4  ;;  %s25_s27 = int_to_ptr.vmem [resolvable:$true] %s24_s27 }
  0x16   :  { %23 = dma.vmem_to_smem %s21_s22, 16, %s2593_s0, [#allocation3] }
  0x17   :  { %s2404_s28 = scalar_lea.vmem %s25_s27, 16  ;;  %p2409_p11 = scmp.lt.s32.totalorder %s25_s27, %s25_s27 }
  0x18   :  { %p2405_p10 = scmp.ne.s32.totalorder %s25_s27, %s2404_s28  ;;  %p2410_p12 = scmp.lt.s32.totalorder %s2404_s28, %s2404_s28 }
  0x1a   :  { %p2411_p13 = por %p2410_p12, %p2409_p11 }
  0x1c   :  { %p2412_p0 = pnand %p2411_p13, %p2405_p10 }
  0x1e   :  { %2415 = shalt.err (!%p2412_p0)  }
  0x1f   :  { %s2594_s29 = smov [#allocation6]  }
  0x20   :  { %27 = dma.vmem_to_smem %s25_s27, 16, %s2594_s29, [#allocation3] }
  0x21   :  { %2550 = dma.done.wait [#allocation3], 48 }
  0x22   :  { %2551 = vsyncadd [#allocation3], 4294967248 }
  0x23   :  { %29 = sfence }
  0x24   :  { %30 = vsyncpa [#allocation8], 0 }
  0x25   :  { %32 = vsyncpa [#allocation8 + $0x1], 0 }
  0x26   :  { %33 = vsyncpa [#allocation11], 0 }
  0x27   :  { %34 = vsyncpa [#allocation9], 0 }
  0x28   :  { %36 = vsyncpa [#allocation9 + $0x1], 0  ;;  %s2677_s30 = smov 0   ;;  %s2679_s2 = smov 0  }
  0x29   :  { %s2681_s12 = smov 0   ;;  %s2683_s13 = smov 0  }
  0x2a   :  { %s2685_s14 = smov 0   ;;  %s2687_s15 = smov 0  }
  0x2b   :  { %s2689_s16 = smov 0  }
  0x2c LB: > { %3545 = sst [smem:[#allocation21_spill]] %s2574_s12  ;;  %s2711_s17 = sadd.s32 4294967295, %s2590_s16   ;;  %s2590_s16 = sphi %s2689_s16, %s3606_s16   ;;  %s2586_s15 = sphi %s2687_s15, %s3613_s15   ;;  %s2582_s14 = sphi %s2685_s14, %s3612_s14   ;;  %s2578_s13 = sphi %s2683_s13, %s3611_s13   ;;  %s2574_s12 = sphi %s2681_s12, %s3608_s12   ;;  %s2570_s2 = sphi %s2679_s2, %s3610_s2   ;;  %s2566_s30 = sphi %s2677_s30, %s3609_s30  }
  0x2d   : > { %s1903_s18 = sadd.s32 4294967294, %s2590_s16   ;;  %s2715_s19 = sadd.s32 1, %s2590_s16  }
  0x2e   : > { %3546 = sst [smem:[#allocation22_spill]] %s2715_s19  ;;  %p142_p1 = scmp.ne.s32.totalorder %s2582_s14, %s2578_s13 }
  0x2f   : > { %p3533_p2 = scmp.eq.s32.totalorder %s2711_s17, 0  ;;  %s236_s20 = sld [smem:[#allocation4 + %s2590_s16]] }
  0x30   : > { %s237_s21 = sld [smem:[#allocation4 + %s2715_s19]]  ;;  %s241_s22 = sadd.s32 1, %s2574_s12 }
  0x31   : > { %p2724_p3 = por %p3533_p2, %p142_p1  ;;  %p251_p4 = scmp.ne.s32.totalorder %s2574_s12, %s2570_s2 }
  0x32   : > { %p252_p5 = scmp.eq.s32.totalorder %s2711_s17, 1  ;;  %p257_p6 = scmp.ne.s32.totalorder %s2570_s2, %s2566_s30 }
  0x33   : > { %s3547_s23 = scalar_select %p2724_p3, 1, 0 }
  0x34   : > { %p258_p7 = scmp.eq.s32.totalorder %s1903_s18, 1  ;;  %p1904_p8 = scmp.ge.s32.totalorder %s2590_s16, 1 }
  0x35   : > { %p2734_p9 = por %p252_p5, %p251_p4  ;;  %p265_p10 = scmp.lt.s32.totalorder %s2590_s16, 3 }
  0x36   : > { %p2739_p11 = por %p258_p7, %p257_p6  ;;  %s238_s0 = ssub.s32 %s236_s20, %s237_s21 }
  0x37   : > { %s3548_s24 = scalar_select %p2734_p9, 1, 0 }
  0x38   : > { %s3549_s25 = scalar_select %p2739_p11, 1, 0 }
  0x39   : > { %p2743_p12 = pnand %p1904_p8, %p265_p10  ;;  %p239_p13 = scmp.eq.s32.totalorder %s238_s0, 0 }
  0x3a   : > { %3550 = sst [smem:[#allocation23_spill]] %s3549_s25  ;;  %s2595_s26 = smov [#allocation10]  }
  0x3b   : > { %s3551_s1 = scalar_select %p2743_p12, 1, 0 }
  0x3c   : > { %p2205_p0 = pneg %p2743_p12  ;;  %s277_s27 = sshll.u32 %s2595_s26, 4  ;;  %s278_s27 = int_to_ptr.vmem [resolvable:$true] %s277_s27 }
  0x3d   : > { %s2750_s28 = scalar_select %p239_p13, %s2574_s12, %s241_s22  }
  0x3e   : > { %p2754_p1 = pnand %p2205_p0, %p3533_p2  ;;  %s2427_s13 = scalar_lea.vmem %s278_s27, 1024 }
  0x3f   : > { %3552 = sst [smem:[#allocation24_spill]] %s2750_s28  ;;  %p2428_p6 = scmp.ne.s32.totalorder %s278_s27, %s2427_s13 }
  0x40   : > { %p2418_p5 = pneg %p2754_p1  ;;  %p2435_p10 = scmp.lt.s32.totalorder %s278_s27, %s278_s27 }
  0x41   : > { %p2436_p13 = scmp.lt.s32.totalorder %s2427_s13, %s2427_s13 }
  0x42   : > { %p2430_p7 = pnand %p2428_p6, %p2418_p5 }
  0x43   : > { %p2437_p11 = por %p2436_p13, %p2435_p10 }
  0x44   : > { %p2431_p8 = pneg %p2430_p7 }
  0x46   : > { %p2438_p9 = pnand %p2437_p11, %p2431_p8 }
  0x48   : > { %2441 = shalt.err (!%p2438_p9)
}
  0x49   : > { %s2596_s18 = smov 64   ;;  %s2597_s20 = smov 4  }
  0x4a   : > { %s3554_s7 = sld [smem:[#allocation29_spill]]  ;;  %s2598_s0 = smov [#allocation12]  }
  0x4b   : > { %s293_s26 = sshll.u32 %s2598_s0, 4  ;;  %s124_s28 = sld [smem:[#allocation4 + %s2590_s16]]  ;;  %s294_s26 = int_to_ptr.vmem [resolvable:$true] %s293_s26 }
  0x4c   : > { %s2453_s12 = scalar_lea.vmem %s294_s26, 1024  ;;  %p2461_p6 = scmp.lt.s32.totalorder %s294_s26, %s294_s26 }
  0x4d   : > { %p2454_p0 = scmp.ne.s32.totalorder %s294_s26, %s2453_s12  ;;  %p2462_p7 = scmp.lt.s32.totalorder %s2453_s12, %s2453_s12 }
  0x4f   : > { %p2456_p11 = pnand %p2454_p0, %p2418_p5  ;;  %p2463_p8 = por %p2462_p7, %p2461_p6 }
  0x50   : > { %2208 = dma.hbm_to_vmem [thread:$0]  (!%p2754_p1), %s3554_s7, 1024, %s278_s27, [#allocation11], %s2596_s18, %s2596_s18, %s2597_s20  }
  0x51   : > { %p2457_p9 = pneg %p2456_p11 }
  0x53   : > { %p2464_p10 = pnand %p2463_p8, %p2457_p9 }
  0x55   : > { %2467 = shalt.err (!%p2464_p10)
}
  0x56   : > { %s3555_s9 = sld [smem:[#allocation30_spill]]  ;;  %p136_p5 = scmp.ne.s32.totalorder %s2586_s15, %s2582_s14 }
  0x57   : > { %s125_s27 = sld [smem:[#allocation4 + %s2715_s19]]  ;;  %p137_p13 = scmp.eq.s32.totalorder %s2590_s16, 0 }
  0x58   : > { %s336_s12 = sand.u32 1, %s2586_s15   ;;  %s129_s22 = sadd.s32 1, %s2586_s15 }
  0x59   : > { %p138_p0 = por %p137_p13, %p136_p5  ;;  %p2224_p11 = scmp.lt.s32.totalorder %s2590_s16, 2 }
  0x5a   : > { %s1908_s0 = sshll.u32 %s336_s12, 7  ;;  %s2800_s19 = scalar_lea.sflag [#allocation8], %s336_s12 }
  0x5b   : > { %p2785_p6 = pnand %p2224_p11, %p138_p0 }
  0x5c   : > { %2211 = dma.hbm_to_vmem [thread:$0]  (!%p2754_p1), %s3555_s9, 1024, %s294_s26, [#allocation11], %s2596_s18, %s2596_s18, %s2597_s20  }
  0x5d   : > { %s126_s29 = ssub.s32 %s124_s28, %s125_s27  ;;  %s340_s20 = scalar_lea.vmem [#allocation7], %s1908_s0 }
  0x5e   : > { %p127_p9 = scmp.eq.s32.totalorder %s126_s29, 0  ;;  %s348_s26 = sshll.u32 %s340_s20, 4  ;;  %s2793_s26 = int_to_ptr.vmem [resolvable:$true] %s348_s26 }
  0x5f   : > { %s2193_s21 = scalar_select %p138_p0, [#allocation4], [#allocation14] }
  0x60   : > { %s2790_s7 = scalar_select %p127_p9, %s2586_s15, %s129_s22  }
  0x61   : > { %s2194_s25 = scalar_select %p138_p0, %s2590_s16, 0 }
  0x62   : > { %s3615_s21 = smov (!%p2224_p11, %s2193_s21), [#allocation16]  ;;  %p2470_p7 = pneg %p2785_p6 }
  0x63   : > { %s3617_s25 = smov (!%p2224_p11, %s2194_s25), 0 }
  0x64   : > { %s341_s18 = sld [smem:[%s3615_s21 + %s3617_s25]]  ;;  %s2473_s21 = scalar_lea.hbm %s3520_s6, 2048 }
  0x6a   : > { %s2011_s9 = sshll.u32 %s341_s18, 11 }
  0x6b   : > { %s2798_s29 = scalar_lea.hbm %s3520_s6, %s2011_s9 }
  0x6c   : > { %s2468_s22 = scalar_lea.hbm %s2798_s29, 2048  ;;  %p2474_p5 = scmp.lt.s32.totalorder %s2798_s29, %s3520_s6 }
  0x6d   : > { %p2469_p1 = scmp.ne.s32.totalorder %s2798_s29, %s2468_s22  ;;  %p2475_p13 = scmp.lt.s32.totalorder %s2473_s21, %s2468_s22 }
  0x6f   : > { %p2471_p8 = pnand %p2470_p7, %p2469_p1  ;;  %p2476_p0 = por %p2475_p13, %p2474_p5 }
  0x71   : > { %p2472_p10 = pneg %p2471_p8 }
  0x73   : > { %p2477_p11 = pnand %p2476_p0, %p2472_p10 }
  0x75   : > { %2480 = shalt.err (!%p2477_p11)
}
  0x76   : > { %s2481_s9 = scalar_lea.vmem %s2793_s26, 2048  ;;  %s2599_s12 = smov [#allocation7]  }
  0x77   : > { %p2482_p9 = scmp.ne.s32.totalorder %s2793_s26, %s2481_s9  ;;  %s2486_s28 = sshll.u32 %s2599_s12, 4  ;;  %s2487_s28 = int_to_ptr.vmem [resolvable:$false] %s2486_s28 }
  0x78   : > { %s2488_s27 = scalar_lea.vmem %s2487_s28, 4096  ;;  %p2489_p8 = scmp.lt.s32.totalorder %s2793_s26, %s2487_s28 }
  0x79   : > { %p2484_p4 = pnand %p2482_p9, %p2470_p7  ;;  %p2490_p2 = scmp.lt.s32.totalorder %s2488_s27, %s2481_s9 }
  0x7b   : > { %p2485_p1 = pneg %p2484_p4  ;;  %p2491_p3 = por %p2490_p2, %p2489_p8 }
  0x7d   : > { %p2492_p12 = pnand %p2491_p3, %p2485_p1 }
  0x7f   : > { %2495 = shalt.err (!%p2492_p12)
}
  0x80   : > { %s2600_s22 = smov 128   ;;  %s2601_s25 = smov 8  }
  0x81   : > { %2217 = dma.hbm_to_vmem [thread:$0]  (!%p2785_p6), %s2798_s29, 2048, %s2793_s26, %s2800_s19, %s2600_s22, %s2600_s22, %s2601_s25  }
  0x82   : > { %p3557_p7 = scmp.ne.s32.totalorder %s3551_s1, 0 }
  0x84   : > { %360 = sbr.rel (%p3557_p7) target bundleno = 1080 (0x438), region = 52 }
  0x89   : > { %s362_s0 = sand.u32 1, %s2582_s14   ;;  %p3558_p2 = scmp.ne.s32.totalorder %s3547_s23, 0 }
  0x8a   : > { %s1912_s21 = sshll.u32 %s362_s0, 7  ;;  %s363_s18 = scalar_lea.sflag [#allocation8], %s362_s0 }
  0x8b   : > { %s2824_s20 = scalar_lea.vmem [#allocation7], %s1912_s21 }
  0x8c   : > { %2553 = dma.done.wait (%p3558_p2), %s363_s18, 2048  }
  0x8d   : > { %2555 = vsyncadd (%p3558_p2), %s363_s18, 4294965248  ;;  %p3559_p3 = scmp.eq.s32.totalorder %s2711_s17, 0 }
  0x8f   : > { %2557 = dma.done.wait (%p3559_p3), [#allocation11], 2048   ;;  %p3560_p12 = pmov %p3559_p3 }
  0x90   : > { %s3536_s19 = sand.u32 1, %s2570_s2   ;;  %s1916_s1 = sshll.u32 %s2711_s17, 5 }
  0x91   : > { %2559 = vsyncadd (%p3560_p12), [#allocation11], 4294965248  ;;  %s443_s13 = sld [smem:[#allocation5 + %s2711_s17]]  ;;  %s1915_s26 = sshll.u32 %s3536_s19, 7 }
  0x92   : > { %p422_p4 = scmp.lt.s32.totalorder %s1916_s1, 63  ;;  %s1920_s29 = sshll.u32 %s2711_s17, 1 }
  0x93   : > { %p434_p6 = scmp.lt.s32.totalorder %s1920_s29, 3  ;;  %s2856_s19 = scalar_lea.vmem [#allocation13], %s1915_s26 }
  0x94   : > { %s3619_s1 = smov (!%p422_p4, %s1916_s1), 63 }
  0x95   : > { %s1917_s23 = sshll.u32 %s3619_s1, 3  ;;  %s3621_s29 = smov (!%p434_p6, %s1920_s29), 3 }
  0x96   : > { %s2843_s28 = scalar_lea.vmem %s3517_s3, %s1917_s23  ;;  %s2848_s25 = scalar_lea.vmem %s3518_s4, %s1917_s23 }
  0x97   : > { %s436_s18 = scalar_lea.vmem %s3519_s5, %s3621_s29  ;;  %p1921_p10 = scmp.eq.s32.totalorder %s443_s13, 0 }
  0x99   : > { %447 = sbr.rel (%p1921_p10) target bundleno = 167 (0xa7), region = 68 }
  0x9e   : > { %v2602_v0 = vmov 0.0  }
  0x9f   : > { %448 = vst [vmem:[#allocation2 + $0x30] sm:$0xff] %v2602_v0  ;;  %449 = vst [vmem:[#allocation2] sm:$0xff] %v2602_v0 }
  0xa0   : > { %450 = vst [vmem:[#allocation2 + $0x58] sm:$0xff] %v2602_v0  ;;  %451 = vst [vmem:[#allocation2 + $0x18] sm:$0xff] %v2602_v0 }
  0xa1   : > { %452 = vst [vmem:[#allocation2 + $0x50] sm:$0xff] %v2602_v0  ;;  %453 = vst [vmem:[#allocation2 + $0x68] sm:$0xff] %v2602_v0 }
  0xa2   : > { %454 = vst [vmem:[#allocation2 + $0x8] sm:$0xff] %v2602_v0  ;;  %455 = vst [vmem:[#allocation2 + $0x48] sm:$0xff] %v2602_v0 }
  0xa3   : > { %456 = vst [vmem:[#allocation2 + $0x40] sm:$0xff] %v2602_v0  ;;  %457 = vst [vmem:[#allocation2 + $0x20] sm:$0xff] %v2602_v0 }
  0xa4   : > { %458 = vst [vmem:[#allocation2 + $0x10] sm:$0xff] %v2602_v0  ;;  %459 = vst [vmem:[#allocation2 + $0x38] sm:$0xff] %v2602_v0 }
  0xa5   : > { %460 = vst [vmem:[#allocation2 + $0x60] sm:$0xff] %v2602_v0  ;;  %461 = vst [vmem:[#allocation2 + $0x70] sm:$0xff] %v2602_v0 }
  0xa6   : > { %462 = vst [vmem:[#allocation2 + $0x78] sm:$0xff] %v2602_v0  ;;  %463 = vst [vmem:[#allocation2 + $0x28] sm:$0xff] %v2602_v0 }
  0xa7 PF: > { %v814_v1 = vld [vmem:[%s2848_s25 + $0xf0] sm:$0xff]  ;;  %v2603_v3 = vmov 0   ;;  %v815_v4 = vld [vmem:[%s2848_s25 + $0xf8] sm:$0xff]  ;;  %v812_v6 = vld [vmem:[%s2848_s25 + $0xe0] sm:$0xff]  ;;  %s1008_s1 = sld [smem:[#allocation4 + %s2711_s17]] }
  0xa8   : > { %v798_v2 = vld [vmem:[%s2848_s25 + $0x70] sm:$0xff]  ;;  %2299 = vset.pattern.permute.xlu1 %v2603_v3  ;;  %2298 = vset.pattern.permute.xlu0 %v2603_v3  ;;  %v799_v5 = vld [vmem:[%s2848_s25 + $0x78] sm:$0xff]  ;;  %v813_v7 = vld [vmem:[%s2848_s25 + $0xe8] sm:$0xff]  ;;  %v1010_v3 = vlaneseq  ;;  %s3410_s29 = sld [smem:[#allocation6 + %s2711_s17]] }
  0xa9   : > { %968 = vperm.xlu0 %2298, %v814_v1   ;;  %888 = vperm.xlu1 %2299, %v798_v2   ;;  %v797_v8 = vld [vmem:[%s2848_s25 + $0x68] sm:$0xff]  ;;  %v796_v9 = vld [vmem:[%s2848_s25 + $0x60] sm:$0xff]  ;;  %v811_v10 = vld [vmem:[%s2848_s25 + $0xd8] sm:$0xff] }
  0xaa   : > { %v810_v11 = vld [vmem:[%s2848_s25 + $0xd0] sm:$0xff]  ;;  %v795_v12 = vld [vmem:[%s2848_s25 + $0x58] sm:$0xff]  ;;  %v809_v14 = vld [vmem:[%s2848_s25 + $0xc8] sm:$0xff] }
  0xab   : > { %v794_v13 = vld [vmem:[%s2848_s25 + $0x50] sm:$0xff]  ;;  %v808_v15 = vld [vmem:[%s2848_s25 + $0xc0] sm:$0xff]  ;;  %v793_v16 = vld [vmem:[%s2848_s25 + $0x48] sm:$0xff] }
  0xac   : > { %v792_v17 = vld [vmem:[%s2848_s25 + $0x40] sm:$0xff]  ;;  %v807_v18 = vld [vmem:[%s2848_s25 + $0xb8] sm:$0xff]  ;;  %v806_v19 = vld [vmem:[%s2848_s25 + $0xb0] sm:$0xff] }
  0xad   : > { %973 = vperm.xlu0 %2298, %v815_v4   ;;  %893 = vperm.xlu1 %2299, %v799_v5   ;;  %v791_v20 = vld [vmem:[%s2848_s25 + $0x38] sm:$0xff]  ;;  %v790_v21 = vld [vmem:[%s2848_s25 + $0x30] sm:$0xff]  ;;  %v805_v22 = vld [vmem:[%s2848_s25 + $0xa8] sm:$0xff]  ;;  %s1922_s13 = sshll.u32 %s1008_s1, 7 }
  0xae   : > { %v804_v23 = vld [vmem:[%s2848_s25 + $0xa0] sm:$0xff]  ;;  %v789_v24 = vld [vmem:[%s2848_s25 + $0x28] sm:$0xff]  ;;  %v803_v26 = vld [vmem:[%s2848_s25 + $0x98] sm:$0xff]  ;;  %p1987_p5 = scmp.eq.s32.totalorder %s3410_s29, 0 }
  0xaf   : > { %v788_v25 = vld [vmem:[%s2848_s25 + $0x20] sm:$0xff]  ;;  %v802_v27 = vld [vmem:[%s2848_s25 + $0x90] sm:$0xff]  ;;  %v787_v28 = vld [vmem:[%s2848_s25 + $0x18] sm:$0xff] }
  0xb0   : > { %v786_v29 = vld [vmem:[%s2848_s25 + $0x10] sm:$0xff]  ;;  %v801_v31 = vld [vmem:[%s2848_s25 + $0x88] sm:$0xff]  ;;  %v800_v32 = vld [vmem:[%s2848_s25 + $0x80] sm:$0xff] }
  0xb1   : > { %958 = vperm.xlu0 %2298, %v812_v6   ;;  %963 = vperm.xlu1 %2299, %v813_v7   ;;  %v2887_v30 = vld [vmem:[%s2843_s28 + $0xf0] sm:$0xff]  ;;  %v2896_v35 = vld [vmem:[%s2843_s28 + $0xf8] sm:$0xff]  ;;  %v785_v38 = vld [vmem:[%s2848_s25 + $0x8] sm:$0xff] }
  0xb2   : > { %v2892_v33 = vld [vmem:[%s2843_s28 + $0x70] sm:$0xff]  ;;  %v558_v34 = vmul.f32 0.044715, %v2887_v30  ;;  %v2900_v37 = vld [vmem:[%s2843_s28 + $0x78] sm:$0xff]  ;;  %v784_v39 = vld [vmem:[%s2848_s25] sm:$0xff] }
  0xb3   : > { %v542_v36 = vmul.f32 0.044715, %v2892_v33  ;;  %v559_v40 = vmul.f32 0.044715, %v2896_v35  ;;  %v2906_v41 = vld [vmem:[%s2843_s28 + $0xe0] sm:$0xff]  ;;  %v2913_v46 = vld [vmem:[%s2843_s28 + $0xe8] sm:$0xff] }
  0xb4   : > { %v590_v42 = vmul.f32 %v558_v34, %v2887_v30  ;;  %v543_v43 = vmul.f32 0.044715, %v2900_v37  ;;  %v556_v45 = vmul.f32 0.044715, %v2906_v41  ;;  %v2917_v48 = vld [vmem:[%s2843_s28 + $0x68] sm:$0xff]  ;;  %v2932_v60 = vld [vmem:[%s2843_s28 + $0x60] sm:$0xff] }
  0xb5   : > { %883 = vperm.xlu1 %2299, %v797_v8   ;;  %878 = vperm.xlu0 %2298, %v796_v9   ;;  %v574_v44 = vmul.f32 %v542_v36, %v2892_v33  ;;  %v591_v47 = vmul.f32 %v559_v40, %v2896_v35  ;;  %v557_v52 = vmul.f32 0.044715, %v2913_v46  ;;  %v541_v54 = vmul.f32 0.044715, %v2917_v48 }
  0xb6   : > { %v622_v49 = vmul.f32 %v590_v42, %v2887_v30  ;;  %v575_v50 = vmul.f32 %v543_v43, %v2900_v37  ;;  %v588_v53 = vmul.f32 %v556_v45, %v2906_v41  ;;  %v540_v2 = vmul.f32 0.044715, %v2932_v60  ;;  %v2991_v45 = vld [vmem:[%s2843_s28 + $0x58] sm:$0xff] }
  0xb7   : > { %v606_v51 = vmul.f32 %v574_v44, %v2892_v33  ;;  %v623_v55 = vmul.f32 %v591_v47, %v2896_v35  ;;  %v589_v59 = vmul.f32 %v557_v52, %v2913_v46  ;;  %v573_v62 = vmul.f32 %v541_v54, %v2917_v48  ;;  %v3005_v52 = vld [vmem:[%s2843_s28 + $0x50] sm:$0xff] }
  0xb8   : > { %v654_v56 = vadd.f32 %v622_v49, %v2887_v30  ;;  %v607_v57 = vmul.f32 %v575_v50, %v2900_v37  ;;  %v620_v61 = vmul.f32 %v588_v53, %v2906_v41  ;;  %v2942_v8 = vshrl.u32 %v1010_v3, 7 }
  0xb9   : > { %953 = vperm.xlu1 %2299, %v811_v10   ;;  %948 = vperm.xlu0 %2298, %v810_v11   ;;  %v638_v58 = vadd.f32 %v606_v51, %v2892_v33  ;;  %v655_v63 = vadd.f32 %v623_v55, %v2896_v35  ;;  %v621_v5 = vmul.f32 %v589_v59, %v2913_v46  ;;  %v2944_v9 = vstv %s1922_s13 }
  0xba   : > { %v686_v0 = vmul.f32 0.7978846, %v654_v56  ;;  %v639_v1 = vadd.f32 %v607_v57, %v2900_v37  ;;  %v652_v6 = vadd.f32 %v620_v61, %v2906_v41  ;;  %v605_v7 = vmul.f32 %v573_v62, %v2917_v48 }
  0xbb   : > { %v670_v4 = vmul.f32 0.7978846, %v638_v58  ;;  %v687_v10 = vmul.f32 0.7978846, %v655_v63  ;;  %v1013_v43 = vadd.s32 16, %v2942_v8  ;;  %v1014_v49 = vadd.s32 24, %v2942_v8 }
  0xbc   : > { %2300 = vtanh.f32 %v686_v0  ;;  %v671_v11 = vmul.f32 0.7978846, %v639_v1  ;;  %v1021_v51 = vadd.s32 80, %v2942_v8  ;;  %v1022_v54 = vadd.s32 88, %v2942_v8  ;;  %v1171_v1 = vld [vmem:[#allocation2 + $0x8] sm:$0xff] }
  0xbd   : > { %873 = vperm.xlu1 %2299, %v795_v12   ;;  %868 = vperm.xlu0 %2298, %v794_v13   ;;  %v572_v12 = vmul.f32 %v540_v2, %v2932_v60  ;;  %v2948_v13 = vld [vmem:[%s2843_s28 + $0xd8] sm:$0xff]  ;;  %2302 = vtanh.f32 %v670_v4  ;;  %v1030_v50 = vadd.s32 %v2944_v9, %v1013_v43  ;;  %v1031_v53 = vadd.s32 %v2944_v9, %v1014_v49  ;;  %v3091_v43 = vld [vmem:[%s2843_s28 + $0xc0] sm:$0xff] }
  0xbe   : > { %2304 = vtanh.f32 %v687_v10  ;;  %v1015_v55 = vadd.s32 32, %v2942_v8  ;;  %v1016_v56 = vadd.s32 40, %v2942_v8  ;;  %v539_v57 = vmul.f32 0.044715, %v2991_v45 }
  0xbf   : > { %2306 = vtanh.f32 %v671_v11  ;;  %v1038_v59 = vadd.s32 %v2944_v9, %v1021_v51  ;;  %v1039_v63 = vadd.s32 %v2944_v9, %v1022_v54  ;;  %v538_v0 = vmul.f32 0.044715, %v3005_v52 }
  0xc0   : > { %v1032_v2 = vadd.s32 %v2944_v9, %v1015_v55  ;;  %v1023_v10 = vadd.s32 96, %v2942_v8  ;;  %v1024_v11 = vadd.s32 104, %v2942_v8  ;;  %v3577_v49 = vmov 0 }
  0xc1   : > { %943 = vperm.xlu1 %2299, %v809_v14   ;;  %938 = vperm.xlu0 %2298, %v808_v15   ;;  %v1012_v14 = vadd.s32 8, %v2942_v8  ;;  %v1044_v15 = vld [vmem:[%s436_s18] sm:$0x3]  ;;  %v552_v55 = vmul.f32 0.044715, %v3091_v43 }
  0xc5   : > { %863 = vperm.xlu1 %2299, %v793_v16   ;;  %858 = vperm.xlu0 %2298, %v792_v17   ;;  %v653_v16 = vadd.f32 %v621_v5, %v2913_v46  ;;  %v1028_v17 = vadd.s32 %v2944_v9, %v2942_v8 }
  0xc9   : > { %933 = vperm.xlu1 %2299, %v807_v18   ;;  %928 = vperm.xlu0 %2298, %v806_v19   ;;  %v1047_v18 = vsub.s32 0, %v2942_v8  ;;  %v1051_v19 = vsub.s32 1, %v2942_v8  ;;  %v3020_v61 = vpop.eup %2300 }
  0xca   : > { %v3034_v3 = vpop.eup %2302 }
  0xcd   : > { %853 = vperm.xlu1 %2299, %v791_v20   ;;  %848 = vperm.xlu0 %2298, %v790_v21   ;;  %v684_v20 = vmul.f32 0.7978846, %v652_v6  ;;  %v637_v21 = vadd.f32 %v605_v7, %v2917_v48  ;;  %v1033_v6 = vadd.s32 %v2944_v9, %v1016_v56  ;;  %v3581_v56 = vmov 0 }
  0xcf   : > { %2308 = vtanh.f32 %v684_v20  ;;  %v2979_v34 = vmul.f32 0.7978846, %v637_v21  ;;  %v1040_v21 = vadd.s32 %v2944_v9, %v1023_v10  ;;  %v584_v10 = vmul.f32 %v552_v55, %v3091_v43  ;;  %v1165_v20 = vld [vmem:[#allocation2 + $0x30] sm:$0xff] }
  0xd0   : > { %v3205_v55 = vmul.f32 0.5, %v3091_v43 }
  0xd1   : > { %923 = vperm.xlu1 %2299, %v805_v22   ;;  %918 = vperm.xlu0 %2298, %v804_v23   ;;  %v2963_v22 = vld [vmem:[%s2843_s28 + $0xd0] sm:$0xff]  ;;  %v1029_v23 = vadd.s32 %v2944_v9, %v1012_v14 }
  0xd5   : > { %843 = vperm.xlu1 %2299, %v789_v24   ;;  %838 = vperm.xlu0 %2298, %v788_v25   ;;  %v555_v24 = vmul.f32 0.044715, %v2948_v13  ;;  %v2967_v25 = vrot.slane %v1044_v15, %v1047_v18 }
  0xd7   : > { %v587_v36 = vmul.f32 %v555_v24, %v2948_v13  ;;  %vm1053_vm3 = vcmp.eq.s32.totalorder %v1028_v17, %v2967_v25  ;;  %vm1055_vm4 = vcmp.eq.s32.totalorder %v1029_v23, %v2967_v25  ;;  %vm1057_vm13 = vcmp.eq.s32.totalorder %v1030_v50, %v2967_v25 }
  0xd8   : > { %vm2994_vm6 = vmpackc.low %vm1055_vm4, %vm1053_vm3  ;;  %vm1059_vm15 = vcmp.eq.s32.totalorder %v1031_v53, %v2967_v25  ;;  %v1025_v24 = vadd.s32 112, %v2942_v8 }
  0xd9   : > { %913 = vperm.xlu1 %2299, %v803_v26   ;;  %908 = vperm.xlu0 %2298, %v802_v27   ;;  %v2969_v26 = vrot.slane %v1044_v15, %v1051_v19  ;;  %v1019_v27 = vadd.s32 64, %v2942_v8  ;;  %v619_v62 = vmul.f32 %v587_v36, %v2948_v13  ;;  %vm3039_vm4 = vmpackc.low %vm1059_vm15, %vm1057_vm13  ;;  %vm1063_vm13 = vcmp.eq.s32.totalorder %v1033_v6, %v2967_v25  ;;  %v3067_v19 = vld [vmem:[%s2843_s28 + $0xc8] sm:$0xff] }
  0xda   : > { %v1017_v15 = vadd.s32 48, %v2942_v8  ;;  %v1042_v51 = vadd.s32 %v2944_v9, %v1025_v24  ;;  %v3161_v24 = vmul.f32 0.5, %v2906_v41  ;;  %v3175_v41 = vmul.f32 0.5, %v2932_v60 }
  0xdb   : > { %vm1054_vm0 = vcmp.eq.s32.totalorder %v1028_v17, %v2969_v26  ;;  %vm1056_vm1 = vcmp.eq.s32.totalorder %v1029_v23, %v2969_v26  ;;  %vm1058_vm12 = vcmp.eq.s32.totalorder %v1030_v50, %v2969_v26  ;;  %vm1060_vm14 = vcmp.eq.s32.totalorder %v1031_v53, %v2969_v26 }
  0xdc   : > { %vm1955_vm2 = vmpackc.low %vm1056_vm1, %vm1054_vm0  ;;  %vm1074_vm1 = vcmp.eq.s32.totalorder %v1038_v59, %v2969_v26  ;;  %vm1076_vm3 = vcmp.eq.s32.totalorder %v1039_v63, %v2969_v26  ;;  %v1041_v23 = vadd.s32 %v2944_v9, %v1024_v11  ;;  %v3579_v50 = vmov 0 }
  0xdd   : > { %833 = vperm.xlu1 %2299, %v787_v28   ;;  %828 = vperm.xlu0 %2298, %v786_v29   ;;  %v604_v28 = vmul.f32 %v572_v12, %v2932_v60  ;;  %v554_v29 = vmul.f32 0.044715, %v2963_v22  ;;  %vm3027_vm0 = vmpackc.low %vm1060_vm14, %vm1058_vm12  ;;  %v3053_v12 = vpop.eup %2304  ;;  %vm1064_vm12 = vcmp.eq.s32.totalorder %v1033_v6, %v2969_v26  ;;  %v3590_v6 = vmov 0 }
  0xde   : > { %v3063_v17 = vpop.eup %2306  ;;  %v526_v11 = vmul.f32 0.5, %v2887_v30 }
  0xdf   : > { %v636_v40 = vadd.f32 %v604_v28, %v2932_v60  ;;  %v586_v44 = vmul.f32 %v554_v29, %v2963_v22  ;;  %v571_v28 = vmul.f32 %v539_v57, %v2991_v45  ;;  %v3575_v29 = vmov 0  ;;  %v3120_v57 = vld [vmem:[%s2843_s28 + $0x48] sm:$0xff] }
  0xe1   : > { %903 = vperm.xlu1 %2299, %v801_v31   ;;  %898 = vperm.xlu0 %2298, %v800_v32   ;;  %v2976_v31 = vmul.f32 0.7978846, %v653_v16  ;;  %v1020_v32 = vadd.s32 72, %v2942_v8  ;;  %v3036_v4 = vmul.f32 0.7978846, %v636_v40  ;;  %v1018_v16 = vadd.s32 56, %v2942_v8 }
  0xe2   : > { %v618_v18 = vmul.f32 %v586_v44, %v2963_v22  ;;  %v651_v40 = vadd.f32 %v619_v62, %v2948_v13  ;;  %v553_v44 = vmul.f32 0.044715, %v3067_v19  ;;  %v603_v54 = vmul.f32 %v571_v28, %v2991_v45 }
  0xe3   : > { %v1037_v42 = vadd.s32 %v2944_v9, %v1020_v32  ;;  %v1034_v32 = vadd.s32 %v2944_v9, %v1017_v15  ;;  %v1035_v36 = vadd.s32 %v2944_v9, %v1018_v16  ;;  %v3587_v62 = vmov 0  ;;  %v3152_v16 = vld [vmem:[%s2843_s28 + $0xb8] sm:$0xff] }
  0xe4   : > { %2310 = vtanh.f32 %v2976_v31  ;;  %v537_v31 = vmul.f32 0.044715, %v3120_v57  ;;  %v510_v15 = vmul.f32 0.5, %v2892_v33  ;;  %v616_v28 = vmul.f32 %v584_v10, %v3091_v43  ;;  %v3217_v10 = vld [vmem:[%s2843_s28 + $0xa8] sm:$0xff] }
  0xe5   : > { %823 = vperm.xlu1 %2299, %v785_v38   ;;  %818 = vperm.xlu0 %2298, %v784_v39   ;;  %v3537_v38 = vmov 1.0|1.0   ;;  %v1036_v39 = vadd.s32 %v2944_v9, %v1019_v27  ;;  %vm1072_vm8 = vcmp.eq.s32.totalorder %v1037_v42, %v2969_v26  ;;  %vm1071_vm9 = vcmp.eq.s32.totalorder %v1037_v42, %v2967_v25  ;;  %v3076_v27 = vpop.eup %2308 }
  0xe6   : > { %1956 = vmatprep.mubr.msk.bf16.mxu0 %vm1955_vm2, %v3537_v38  ;;  %vm1073_vm2 = vcmp.eq.s32.totalorder %v1038_v59, %v2967_v25  ;;  %v570_v42 = vmul.f32 %v538_v0, %v3005_v52  ;;  %v683_v59 = vmul.f32 0.7978846, %v651_v40  ;;  %2312 = vtanh.f32 %v2979_v34 }
  0xe7   : > { %vm1070_vm5 = vcmp.eq.s32.totalorder %v1036_v39, %v2969_v26  ;;  %vm1069_vm7 = vcmp.eq.s32.totalorder %v1036_v39, %v2967_v25  ;;  %v1026_v39 = vadd.s32 120, %v2942_v8  ;;  %v650_v8 = vadd.f32 %v618_v18, %v2963_v22 }
  0xe8   : > { %vm1971_vm10 = vmpackc.low %vm1072_vm8, %vm1070_vm5  ;;  %vm1075_vm5 = vcmp.eq.s32.totalorder %v1039_v63, %v2967_v25  ;;  %vm1062_vm8 = vcmp.eq.s32.totalorder %v1032_v2, %v2969_v26  ;;  %v602_v0 = vmul.f32 %v570_v42, %v3005_v52  ;;  %2314 = vtanh.f32 %v3036_v4 }
  0xe9   : > { %1972 = vmatprep.mubr.msk.bf16.mxu1 %vm1971_vm10, %v3537_v38  ;;  %vm3013_vm11 = vmpackc.low %vm1071_vm9, %vm1069_vm7  ;;  %vm1061_vm9 = vcmp.eq.s32.totalorder %v1032_v2, %v2967_v25  ;;  %v1043_v53 = vadd.s32 %v2944_v9, %v1026_v39  ;;  %v3584_v9 = vmov 0  ;;  %v682_v63 = vmul.f32 0.7978846, %v650_v8  ;;  %v3138_v2 = vld [vmem:[%s2843_s28 + $0x40] sm:$0xff]  ;;  %v3189_v8 = vld [vmem:[%s2843_s28 + $0x38] sm:$0xff] }
  0xea   : > { %vm3045_vm7 = vmpackc.low %vm1076_vm3, %vm1074_vm1  ;;  %vm1078_vm1 = vcmp.eq.s32.totalorder %v1040_v21, %v2969_v26  ;;  %v527_v18 = vmul.f32 0.5, %v2896_v35  ;;  %2316 = vtanh.f32 %v683_v59  ;;  %v536_v34 = vmul.f32 0.044715, %v3138_v2 }
  0xeb   : > { %vm3055_vm10 = vmpackc.low %vm1075_vm5, %vm1073_vm2  ;;  %vm1080_vm2 = vcmp.eq.s32.totalorder %v1041_v23, %v2969_v26  ;;  %vm1077_vm5 = vcmp.eq.s32.totalorder %v1040_v21, %v2967_v25  ;;  %v511_v21 = vmul.f32 0.5, %v2900_v37  ;;  %2318 = vtanh.f32 %v682_v63 }
  0xec   : > { %vm3069_vm14 = vmpackc.low %vm1064_vm12, %vm1062_vm8  ;;  %vm1079_vm8 = vcmp.eq.s32.totalorder %v1041_v23, %v2967_v25  ;;  %v3158_v23 = vld [vmem:[%s2843_s28 + $0xb0] sm:$0xff]  ;;  %v634_v30 = vadd.f32 %v602_v0, %v3005_v52  ;;  %v569_v35 = vmul.f32 %v537_v31, %v3120_v57  ;;  %v551_v37 = vmul.f32 0.044715, %v3152_v16 }
  0xed   : > { %vm3081_vm15 = vmpackc.low %vm1063_vm13, %vm1061_vm9  ;;  %vm1066_vm9 = vcmp.eq.s32.totalorder %v1034_v32, %v2969_v26  ;;  %vm1068_vm13 = vcmp.eq.s32.totalorder %v1035_v36, %v2969_v26  ;;  %v550_v39 = vmul.f32 0.044715, %v3158_v23  ;;  %v3179_v40 = vmul.f32 0.5, %v2948_v13 }
  0xee   : > { %v3576_v29 = vsel %vm3081_vm15, 4294967295, %v3575_v29  ;;  %vm3096_vm3 = vmpackc.low %vm1080_vm2, %vm1078_vm1  ;;  %vm1065_vm2 = vcmp.eq.s32.totalorder %v1034_v32, %v2967_v25  ;;  %v3169_v32 = vmul.f32 0.5, %v2913_v46  ;;  %v3182_v42 = vmul.f32 0.5, %v2963_v22 }
  0xef   : > { %v3578_v49 = vsel %vm3096_vm3, 4294967295, %v3577_v49  ;;  %vm3104_vm12 = vmpackc.low %vm1079_vm8, %vm1077_vm5  ;;  %vm1067_vm5 = vcmp.eq.s32.totalorder %v1035_v36, %v2967_v25  ;;  %vm1082_vm8 = vcmp.eq.s32.totalorder %v1042_v51, %v2969_v26  ;;  %vm1081_vm3 = vcmp.eq.s32.totalorder %v1042_v51, %v2967_v25 }
  0xf0   : > { %v3580_v50 = vsel %vm3104_vm12, 4294967295, %v3579_v50  ;;  %vm3113_vm1 = vmpackc.low %vm1068_vm13, %vm1066_vm9  ;;  %vm1084_vm12 = vcmp.eq.s32.totalorder %v1043_v53, %v2969_v26  ;;  %vm1083_vm9 = vcmp.eq.s32.totalorder %v1043_v53, %v2967_v25  ;;  %v585_v26 = vmul.f32 %v553_v44, %v3067_v19 }
  0xf1   : > { %v3582_v56 = vsel %vm3113_vm1, 4294967295, %v3581_v56  ;;  %vm3124_vm15 = vmpackc.low %vm1067_vm5, %vm1065_vm2  ;;  %v635_v25 = vadd.f32 %v603_v54, %v2991_v45  ;;  %v3172_v36 = vmul.f32 0.5, %v2917_v48  ;;  %v3185_v44 = vmul.f32 0.5, %v2991_v45  ;;  %v3202_v54 = vld [vmem:[%s2843_s28 + $0x30] sm:$0xff] }
  0xf2   : > { %3583 = vst [vmem:[#allocation25_spill] sm:$0xff] %v3582_v56  ;;  %v3585_v9 = vsel %vm3124_vm15, 4294967295, %v3584_v9  ;;  %vm3130_vm13 = vmpackc.low %vm1084_vm12, %vm1082_vm8  ;;  %v617_v33 = vmul.f32 %v585_v26, %v3067_v19  ;;  %v568_v46 = vmul.f32 %v536_v34, %v3138_v2  ;;  %v3192_v48 = vmul.f32 0.5, %v3005_v52 }
  0xf3   : > { %3586 = vst [vmem:[#allocation26_spill] sm:$0xff] %v3585_v9  ;;  %v3588_v62 = vsel %vm3130_vm13, 4294967295, %v3587_v62  ;;  %vm3140_vm2 = vmpackc.low %vm1083_vm9, %vm1081_vm3  ;;  %v667_v4 = vmul.f32 0.7978846, %v635_v25  ;;  %v666_v60 = vmul.f32 0.7978846, %v634_v30  ;;  %v648_v22 = vadd.f32 %v616_v28, %v3091_v43 }
  0xf4   : > { %3589 = vst [vmem:[#allocation27_spill] sm:$0xff] %v3588_v62  ;;  %v3591_v6 = vsel %vm3140_vm2, 4294967295, %v3590_v6  ;;  %v3195_v51 = vmul.f32 0.5, %v3067_v19  ;;  %v649_v13 = vadd.f32 %v617_v33, %v3067_v19  ;;  %v601_v45 = vmul.f32 %v569_v35, %v3120_v57  ;;  %v2311_v33 = vpop.eup %2310  ;;  %v3238_v62 = vld [vmem:[%s2843_s28 + $0x28] sm:$0xff] }
  0xf5   : > { %3592 = vst [vmem:[#allocation28_spill] sm:$0xff] %v3591_v6  ;;  %2320 = vtanh.f32 %v667_v4  ;;  %v583_v53 = vmul.f32 %v551_v37, %v3152_v16  ;;  %v3208_v52 = vmul.f32 0.5, %v3120_v57  ;;  %v582_v59 = vmul.f32 %v550_v39, %v3158_v23  ;;  %v2313_v28 = vpop.eup %2312 }
  0xf6   : > { %v535_v19 = vmul.f32 0.044715, %v3189_v8  ;;  %v750_v63 = vadd.f32 1.0, %v3020_v61  ;;  %v734_v0 = vadd.f32 1.0, %v3034_v3  ;;  %v751_v26 = vadd.f32 1.0, %v3053_v12  ;;  %v3227_v12 = vld [vmem:[%s2843_s28 + $0xa0] sm:$0xff] }
  0xf7   : > { %v600_v25 = vmul.f32 %v568_v46, %v3138_v2  ;;  %v735_v43 = vadd.f32 1.0, %v3063_v17  ;;  %v681_v31 = vmul.f32 0.7978846, %v649_v13  ;;  %v3221_v34 = vmul.f32 0.5, %v3138_v2  ;;  %v2315_v46 = vpop.eup %2314 }
  0xf8   : > { %v534_v30 = vmul.f32 0.044715, %v3202_v54  ;;  %2322 = vtanh.f32 %v666_v60  ;;  %v680_v4 = vmul.f32 0.7978846, %v648_v22  ;;  %v633_v61 = vadd.f32 %v601_v45, %v3120_v57  ;;  %v2317_v45 = vpop.eup %2316 }
  0xf9   : > { %v615_v3 = vmul.f32 %v583_v53, %v3152_v16  ;;  %v748_v35 = vadd.f32 1.0, %v3076_v27  ;;  %v614_v17 = vmul.f32 %v582_v59, %v3158_v23  ;;  %v567_v37 = vmul.f32 %v535_v19, %v3189_v8  ;;  %v2319_v59 = vpop.eup %2318 }
  0xfa   : > { %v549_v39 = vmul.f32 0.044715, %v3217_v10  ;;  %v782_v13 = vmul.f32 %v750_v63, %v526_v11  ;;  %v766_v60 = vmul.f32 %v734_v0, %v510_v15  ;;  %v783_v22 = vmul.f32 %v751_v26, %v527_v18 }
  0xfb   : > { %v632_v57 = vadd.f32 %v600_v25, %v3138_v2  ;;  %v767_v53 = vmul.f32 %v735_v43, %v511_v21  ;;  %2324 = vtanh.f32 %v681_v31  ;;  %v566_v38 = vmul.f32 %v534_v30, %v3202_v54  ;;  %v3247_v21 = vld [vmem:[%s2843_s28 + $0x20] sm:$0xff] }
  0xfc   : > { %v548_v27 = vmul.f32 0.044715, %v3227_v12  ;;  %v749_v6 = vadd.f32 1.0, %v2311_v33  ;;  %2326 = vtanh.f32 %v680_v4  ;;  %v665_v19 = vmul.f32 0.7978846, %v633_v61 }
  0xfd   : > { %v647_v9 = vadd.f32 %v615_v3, %v3152_v16  ;;  %v3241_v11 = vmul.f32 %v748_v35, %v3161_v24  ;;  %v646_v2 = vadd.f32 %v614_v17, %v3158_v23  ;;  %v599_v15 = vmul.f32 %v567_v37, %v3189_v8 }
  0xfe   : > { %v581_v18 = vmul.f32 %v549_v39, %v3217_v10  ;;  %v733_v63 = vadd.f32 1.0, %v2313_v28  ;;  %v732_v0 = vadd.f32 1.0, %v2315_v46  ;;  %v747_v26 = vadd.f32 1.0, %v2317_v45  ;;  %v3258_v28 = vld [vmem:[%s2843_s28 + $0x98] sm:$0xff] }
  0xff   : > { %v664_v25 = vmul.f32 0.7978846, %v632_v57  ;;  %v3250_v43 = vmul.f32 0.5, %v3152_v16  ;;  %v598_v31 = vmul.f32 %v566_v38, %v3202_v54  ;;  %v580_v24 = vmul.f32 %v548_v27, %v3227_v12 }
 0x100   : > { %v533_v30 = vmul.f32 0.044715, %v3238_v62  ;;  %v781_v33 = vmul.f32 %v749_v6, %v3169_v32  ;;  %v746_v4 = vadd.f32 1.0, %v2319_v59  ;;  %v679_v61 = vmul.f32 0.7978846, %v647_v9  ;;  %v3272_v32 = vld [vmem:[%s2843_s28 + $0x90] sm:$0xff] }
 0x101   : > { %v532_v3 = vmul.f32 0.044715, %v3247_v21  ;;  %2328 = vtanh.f32 %v665_v19  ;;  %v678_v16 = vmul.f32 0.7978846, %v646_v2  ;;  %v631_v38 = vadd.f32 %v599_v15, %v3189_v8 }
 0x102   : > { %v2321_v35 = vpop.eup %2320  ;;  %v613_v39 = vmul.f32 %v581_v18, %v3217_v10  ;;  %v3263_v46 = vmul.f32 %v733_v63, %v3172_v36  ;;  %v3266_v6 = vmul.f32 %v732_v0, %v3175_v41  ;;  %v3269_v9 = vmul.f32 %v747_v26, %v3179_v40  ;;  %v3285_v26 = vld [vmem:[%s2843_s28 + $0x18] sm:$0xff] }
 0x103   : > { %2330 = vtanh.f32 %v664_v25  ;;  %v630_v57 = vadd.f32 %v598_v31, %v3202_v54  ;;  %v612_v45 = vmul.f32 %v580_v24, %v3227_v12  ;;  %v565_v27 = vmul.f32 %v533_v30, %v3238_v62  ;;  %v3288_v30 = vld [vmem:[%s2843_s28 + $0x10] sm:$0xff] }
 0x104   : > { %v547_v59 = vmul.f32 0.044715, %v3258_v28  ;;  %v3279_v36 = vmul.f32 %v746_v4, %v3182_v42  ;;  %v731_v41 = vadd.f32 1.0, %v2321_v35  ;;  %2332 = vtanh.f32 %v679_v61 }
 0x105   : > { %v564_v40 = vmul.f32 %v532_v3, %v3247_v21  ;;  %v2323_v19 = vpop.eup %2322  ;;  %2334 = vtanh.f32 %v678_v16  ;;  %v663_v18 = vmul.f32 0.7978846, %v631_v38  ;;  %v645_v63 = vadd.f32 %v613_v39, %v3217_v10 }
 0x106   : > { %v546_v0 = vmul.f32 0.044715, %v3272_v32  ;;  %v662_v4 = vmul.f32 0.7978846, %v630_v57  ;;  %v644_v61 = vadd.f32 %v612_v45, %v3227_v12  ;;  %v597_v3 = vmul.f32 %v565_v27, %v3238_v62 }
 0x107   : > { %v579_v35 = vmul.f32 %v547_v59, %v3258_v28  ;;  %v596_v56 = vmul.f32 %v564_v40, %v3247_v21  ;;  %2336 = vtanh.f32 %v663_v18  ;;  %v530_v57 = vmul.f32 0.044715, %v3288_v30 }
 0x108   : > { %v2325_v16 = vpop.eup %2324  ;;  %v677_v59 = vmul.f32 0.7978846, %v645_v63  ;;  %v578_v40 = vmul.f32 %v546_v0, %v3272_v32  ;;  %2338 = vtanh.f32 %v662_v4 }
 0x10a   : > { %2340 = vtanh.f32 %v677_v59 }
 0x124   : > { %v969_v17 = vpop.permute.xlu0 %968  ;;  %v889_v37 = vpop.permute.xlu1 %888 }
 0x125   : > { %v1006_v25 = vmul.f32 %v969_v17, %v782_v13  ;;  %v990_v31 = vmul.f32 %v889_v37, %v766_v60  ;;  %v531_v13 = vmul.f32 0.044715, %v3285_v26  ;;  %v2327_v60 = vpop.eup %2326  ;;  %v3296_v17 = vmul.f32 %v731_v41, %v3185_v44 }
 0x126   : > { %v730_v37 = vadd.f32 1.0, %v2323_v19  ;;  %v745_v44 = vadd.f32 1.0, %v2325_v16  ;;  %v676_v41 = vmul.f32 0.7978846, %v644_v61  ;;  %v629_v19 = vadd.f32 %v597_v3, %v3238_v62  ;;  %v2329_v61 = vpop.eup %2328  ;;  %v3319_v16 = vld [vmem:[%s2843_s28 + $0x8] sm:$0xff] }
 0x127   : > { %v563_v63 = vmul.f32 %v531_v13, %v3285_v26 }
 0x128   : > { %v974_v2 = vpop.permute.xlu0 %973  ;;  %v894_v15 = vpop.permute.xlu1 %893  ;;  %2342 = vtanh.f32 %v676_v41  ;;  %v661_v13 = vmul.f32 0.7978846, %v629_v19 }
 0x129   : > { %v1007_v42 = vmul.f32 %v974_v2, %v783_v22  ;;  %v991_v24 = vmul.f32 %v894_v15, %v767_v53  ;;  %v3302_v2 = vld [vmem:[%s2843_s28 + $0x88] sm:$0xff]  ;;  %v3305_v15 = vld [vmem:[%s2843_s28 + $0x80] sm:$0xff] }
 0x12a   : > { %v544_v4 = vmul.f32 0.044715, %v3305_v15  ;;  %2344 = vtanh.f32 %v661_v13 }
 0x12b   : > { %v1196_v38 = vpack.c.bf16 %v1007_v42, %v1006_v25  ;;  %v1188_v39 = vpack.c.bf16 %v991_v24, %v990_v31  ;;  %v762_v31 = vmul.f32 %v730_v37, %v3192_v48  ;;  %v562_v42 = vmul.f32 %v530_v57, %v3288_v30  ;;  %v2331_v48 = vpop.eup %2330 }
 0x12c   : > { %v959_v22 = vpop.permute.xlu0 %958  ;;  %v964_v53 = vpop.permute.xlu1 %963  ;;  %v545_v24 = vmul.f32 0.044715, %v3302_v2 }
 0x12d   : > { %v1004_v45 = vmul.f32 %v959_v22, %v3241_v11  ;;  %v1005_v27 = vmul.f32 %v964_v53, %v781_v33  ;;  %2013 = vmatprep.subr.bf16.mxu0 %v1196_v38  ;;  %2173 = vmatprep.subr.bf16.mxu1 %v1196_v38  ;;  %v628_v11 = vadd.f32 %v596_v56, %v3247_v21  ;;  %v3323_v22 = vld [vmem:[%s2843_s28] sm:$0xff]  ;;  %v2333_v57 = vpop.eup %2332 }
 0x12e   : > { %2014 = vmatpush3.bf16.msra.mxu0 %v1188_v39  ;;  %2181 = vmatpush3.bf16.msra.mxu1 %v1188_v39  ;;  %v611_v33 = vmul.f32 %v579_v35, %v3258_v28  ;;  %v610_v35 = vmul.f32 %v578_v40, %v3272_v32  ;;  %v777_v38 = vmul.f32 %v745_v44, %v3195_v51  ;;  %v744_v39 = vadd.f32 1.0, %v2327_v60  ;;  %v2335_v44 = vpop.eup %2334 }
 0x12f   : > { %v1195_v18 = vpack.c.bf16 %v1005_v27, %v1004_v45  ;;  %v660_v37 = vmul.f32 0.7978846, %v628_v11  ;;  %v594_v59 = vmul.f32 %v562_v42, %v3288_v30  ;;  %v577_v40 = vmul.f32 %v545_v24, %v3302_v2 }
 0x130   : > { %v884_v0 = vpop.permute.xlu1 %883  ;;  %v879_v25 = vpop.permute.xlu0 %878  ;;  %v576_v51 = vmul.f32 %v544_v4, %v3305_v15  ;;  %v529_v60 = vmul.f32 0.044715, %v3319_v16  ;;  %v528_v11 = vmul.f32 0.044715, %v3323_v22 }
 0x131   : > { %v989_v3 = vmul.f32 %v884_v0, %v3263_v46  ;;  %v988_v56 = vmul.f32 %v879_v25, %v3266_v6  ;;  %2015 = vmatprep.subr.bf16.mxu0 %v1195_v18  ;;  %2174 = vmatprep.subr.bf16.mxu1 %v1195_v18  ;;  %v643_v46 = vadd.f32 %v611_v33, %v3258_v28  ;;  %v728_v0 = vadd.f32 1.0, %v2331_v48 }
 0x132   : > { %v595_v6 = vmul.f32 %v563_v63, %v3285_v26  ;;  %v642_v18 = vadd.f32 %v610_v35, %v3272_v32  ;;  %v776_v33 = vmul.f32 %v744_v39, %v3205_v55  ;;  %v729_v63 = vadd.f32 1.0, %v2329_v61 }
 0x133   : > { %v1187_v53 = vpack.c.bf16 %v989_v3, %v988_v56  ;;  %2346 = vtanh.f32 %v660_v37  ;;  %v675_v42 = vmul.f32 0.7978846, %v643_v46  ;;  %v609_v3 = vmul.f32 %v577_v40, %v3302_v2 }
 0x134   : > { %v954_v45 = vpop.permute.xlu1 %953  ;;  %v949_v27 = vpop.permute.xlu0 %948  ;;  %v627_v24 = vadd.f32 %v595_v6, %v3285_v26  ;;  %v608_v56 = vmul.f32 %v576_v51, %v3305_v15  ;;  %v561_v35 = vmul.f32 %v529_v60, %v3319_v16  ;;  %v674_v48 = vmul.f32 0.7978846, %v642_v18 }
 0x135   : > { %v1003_v41 = vmul.f32 %v954_v45, %v3269_v9  ;;  %v1002_v19 = vmul.f32 %v949_v27, %v3279_v36  ;;  %2016 = vmatpush3.bf16.msra.mxu0 %v1187_v53  ;;  %2182 = vmatpush3.bf16.msra.mxu1 %v1187_v53  ;;  %v626_v36 = vadd.f32 %v594_v59, %v3288_v30  ;;  %v2337_v53 = vpop.eup %2336  ;;  %v743_v46 = vadd.f32 1.0, %v2333_v57 }
 0x136   : > { %v560_v39 = vmul.f32 %v528_v11, %v3323_v22  ;;  %v761_v13 = vmul.f32 %v729_v63, %v3208_v52  ;;  %v760_v37 = vmul.f32 %v728_v0, %v3221_v34  ;;  %v518_v6 = vmul.f32 0.5, %v3158_v23  ;;  %v2339_v45 = vpop.eup %2338 }
 0x137   : > { %v1194_v25 = vpack.c.bf16 %v1003_v41, %v1002_v19  ;;  %v742_v59 = vadd.f32 1.0, %v2335_v44  ;;  %2348 = vtanh.f32 %v675_v42  ;;  %v659_v40 = vmul.f32 0.7978846, %v627_v24  ;;  %v2341_v34 = vpop.eup %2340 }
 0x138   : > { %v874_v4 = vpop.permute.xlu1 %873  ;;  %v869_v9 = vpop.permute.xlu0 %868  ;;  %v641_v60 = vadd.f32 %v609_v3, %v3302_v2  ;;  %v640_v41 = vadd.f32 %v608_v56, %v3305_v15  ;;  %v593_v19 = vmul.f32 %v561_v35, %v3319_v16  ;;  %2350 = vtanh.f32 %v674_v48 }
 0x139   : > { %v987_v55 = vmul.f32 %v874_v4, %v3296_v17  ;;  %v986_v61 = vmul.f32 %v869_v9, %v762_v31  ;;  %2017 = vmatprep.subr.bf16.mxu0 %v1194_v25  ;;  %2175 = vmatprep.subr.bf16.mxu1 %v1194_v25  ;;  %v658_v31 = vmul.f32 0.7978846, %v626_v36  ;;  %v592_v23 = vmul.f32 %v560_v39, %v3323_v22  ;;  %v2343_v63 = vpop.eup %2342 }
 0x13a   : > { %v775_v57 = vmul.f32 %v743_v46, %v3250_v43  ;;  %v503_v44 = vmul.f32 0.5, %v3189_v8  ;;  %v502_v11 = vmul.f32 0.5, %v3202_v54  ;;  %v727_v25 = vadd.f32 1.0, %v2337_v53  ;;  %v2345_v56 = vpop.eup %2344 }
 0x13b   : > { %v1186_v27 = vpack.c.bf16 %v987_v55, %v986_v61  ;;  %v726_v42 = vadd.f32 1.0, %v2339_v45  ;;  %2352 = vtanh.f32 %v659_v40  ;;  %v673_v4 = vmul.f32 0.7978846, %v641_v60 }
 0x13c   : > { %v944_v51 = vpop.permute.xlu1 %943  ;;  %v939_v17 = vpop.permute.xlu0 %938  ;;  %2354 = vtanh.f32 %v658_v31  ;;  %v625_v9 = vadd.f32 %v593_v19, %v3319_v16  ;;  %v672_v43 = vmul.f32 0.7978846, %v640_v41  ;;  %v624_v8 = vadd.f32 %v592_v23, %v3323_v22 }
 0x13d   : > { %v1001_v52 = vmul.f32 %v944_v51, %v777_v38  ;;  %v1000_v18 = vmul.f32 %v939_v17, %v776_v33  ;;  %2018 = vmatpush3.bf16.msra.mxu0 %v1186_v27  ;;  %2183 = vmatpush3.bf16.msra.mxu1 %v1186_v27  ;;  %v774_v33 = vmul.f32 %v742_v59, %v518_v6  ;;  %v517_v54 = vmul.f32 0.5, %v3217_v10 }
 0x13e   : > { %v759_v53 = vmul.f32 %v727_v25, %v503_v44  ;;  %v758_v55 = vmul.f32 %v726_v42, %v502_v11  ;;  %v516_v61 = vmul.f32 0.5, %v3227_v12  ;;  %v741_v6 = vadd.f32 1.0, %v2341_v34 }
 0x13f   : > { %v1193_v0 = vpack.c.bf16 %v1001_v52, %v1000_v18  ;;  %v740_v45 = vadd.f32 1.0, %v2343_v63  ;;  %2356 = vtanh.f32 %v673_v4  ;;  %v656_v59 = vmul.f32 0.7978846, %v624_v8 }
 0x140   : > { %v864_v24 = vpop.permute.xlu1 %863  ;;  %v859_v38 = vpop.permute.xlu0 %858  ;;  %2358 = vtanh.f32 %v672_v43  ;;  %v501_v40 = vmul.f32 0.5, %v3238_v62  ;;  %v500_v51 = vmul.f32 0.5, %v3247_v21  ;;  %v773_v60 = vmul.f32 %v741_v6, %v517_v54 }
 0x141   : > { %v985_v36 = vmul.f32 %v864_v24, %v761_v13  ;;  %v984_v3 = vmul.f32 %v859_v38, %v760_v37  ;;  %2019 = vmatprep.subr.bf16.mxu0 %v1193_v0  ;;  %2176 = vmatprep.subr.bf16.mxu1 %v1193_v0  ;;  %v2347_v48 = vpop.eup %2346  ;;  %v657_v13 = vmul.f32 0.7978846, %v625_v9  ;;  %v772_v41 = vmul.f32 %v740_v45, %v516_v61 }
 0x142   : > { %v725_v19 = vadd.f32 1.0, %v2345_v56  ;;  %v724_v23 = vadd.f32 1.0, %v2347_v48  ;;  %v515_v21 = vmul.f32 0.5, %v3258_v28  ;;  %v514_v25 = vmul.f32 0.5, %v3272_v32 }
 0x143   : > { %v1185_v35 = vpack.c.bf16 %v985_v36, %v984_v3  ;;  %2360 = vtanh.f32 %v657_v13  ;;  %v499_v8 = vmul.f32 0.5, %v3285_v26  ;;  %v498_v56 = vmul.f32 0.5, %v3288_v30 }
 0x144   : > { %v934_v39 = vpop.permute.xlu1 %933  ;;  %v929_v46 = vpop.permute.xlu0 %928  ;;  %2362 = vtanh.f32 %v656_v59  ;;  %v757_v63 = vmul.f32 %v725_v19, %v501_v40  ;;  %v513_v45 = vmul.f32 0.5, %v3302_v2  ;;  %v512_v26 = vmul.f32 0.5, %v3305_v15 }
 0x145   : > { %v999_v37 = vmul.f32 %v934_v39, %v775_v57  ;;  %v998_v27 = vmul.f32 %v929_v46, %v774_v33  ;;  %2020 = vmatpush3.bf16.msra.mxu0 %v1185_v35  ;;  %2184 = vmatpush3.bf16.msra.mxu1 %v1185_v35  ;;  %v2349_v17 = vpop.eup %2348  ;;  %v756_v33 = vmul.f32 %v724_v23, %v500_v51  ;;  %v496_v2 = vmul.f32 0.5, %v3323_v22 }
 0x146   : > { %v2351_v34 = vpop.eup %2350  ;;  %v739_v0 = vadd.f32 1.0, %v2349_v17 }
 0x147   : > { %v1192_v10 = vpack.c.bf16 %v999_v37, %v998_v27  ;;  %v738_v4 = vadd.f32 1.0, %v2351_v34 }
 0x148   : > { %v854_v12 = vpop.permute.xlu1 %853  ;;  %v849_v31 = vpop.permute.xlu0 %848  ;;  %v771_v43 = vmul.f32 %v739_v0, %v515_v21 }
 0x149   : > { %v983_v52 = vmul.f32 %v854_v12, %v759_v53  ;;  %v982_v18 = vmul.f32 %v849_v31, %v758_v55  ;;  %2021 = vmatprep.subr.bf16.mxu0 %v1192_v10  ;;  %2177 = vmatprep.subr.bf16.mxu1 %v1192_v10  ;;  %v2353_v44 = vpop.eup %2352  ;;  %v770_v32 = vmul.f32 %v738_v4, %v514_v25 }
 0x14a   : > { %v2355_v42 = vpop.eup %2354  ;;  %v723_v54 = vadd.f32 1.0, %v2353_v44 }
 0x14b   : > { %v1184_v57 = vpack.c.bf16 %v983_v52, %v982_v18  ;;  %v722_v55 = vadd.f32 1.0, %v2355_v42 }
 0x14c   : > { %v924_v11 = vpop.permute.xlu1 %923  ;;  %v919_v62 = vpop.permute.xlu0 %918  ;;  %v755_v6 = vmul.f32 %v723_v54, %v499_v8  ;;  %v1174_v54 = vld [vmem:[#allocation2 + $0x20] sm:$0xff] }
 0x14d   : > { %v997_v24 = vmul.f32 %v924_v11, %v773_v60  ;;  %v996_v38 = vmul.f32 %v919_v62, %v772_v41  ;;  %2022 = vmatpush3.bf16.msra.mxu0 %v1184_v57  ;;  %2185 = vmatpush3.bf16.msra.mxu1 %v1184_v57  ;;  %v2357_v28 = vpop.eup %2356  ;;  %v754_v59 = vmul.f32 %v722_v55, %v498_v56  ;;  %v497_v60 = vmul.f32 0.5, %v3319_v16 }
 0x14e   : > { %v2359_v61 = vpop.eup %2358  ;;  %v737_v13 = vadd.f32 1.0, %v2357_v28 }
 0x14f   : > { %v1191_v9 = vpack.c.bf16 %v997_v24, %v996_v38  ;;  %v736_v10 = vadd.f32 1.0, %v2359_v61  ;;  %v3593_v24 = vmov 1.0|1.0  }
 0x150   : > { %v844_v36 = vpop.permute.xlu1 %843  ;;  %v839_v3 = vpop.permute.xlu0 %838  ;;  %v769_v31 = vmul.f32 %v737_v13, %v513_v45 }
 0x151   : > { %v981_v35 = vmul.f32 %v844_v36, %v757_v63  ;;  %v980_v53 = vmul.f32 %v839_v3, %v756_v33  ;;  %2023 = vmatprep.subr.bf16.mxu0 %v1191_v9  ;;  %2178 = vmatprep.subr.bf16.mxu1 %v1191_v9  ;;  %v2361_v37 = vpop.eup %2360  ;;  %v768_v15 = vmul.f32 %v736_v10, %v512_v26 }
 0x152   : > { %v2363_v40 = vpop.eup %2362  ;;  %v721_v41 = vadd.f32 1.0, %v2361_v37 }
 0x153   : > { %v1183_v48 = vpack.c.bf16 %v981_v35, %v980_v53  ;;  %v720_v18 = vadd.f32 1.0, %v2363_v40  ;;  %v1176_v40 = vld [vmem:[#allocation2 + $0x38] sm:$0xff] }
 0x154   : > { %v914_v39 = vpop.permute.xlu1 %913  ;;  %v909_v46 = vpop.permute.xlu0 %908  ;;  %v753_v44 = vmul.f32 %v721_v41, %v497_v60 }
 0x155   : > { %v995_v27 = vmul.f32 %v914_v39, %v771_v43  ;;  %v994_v30 = vmul.f32 %v909_v46, %v770_v32  ;;  %2024 = vmatpush3.bf16.msra.mxu0 %v1183_v48  ;;  %2186 = vmatpush3.bf16.msra.mxu1 %v1183_v48  ;;  %v752_v63 = vmul.f32 %v720_v18, %v496_v2  ;;  %v1166_v43 = vld [vmem:[#allocation2] sm:$0xff]  ;;  %v1167_v48 = vld [vmem:[#allocation2 + $0x58] sm:$0xff]  ;;  %v1175_v46 = vld [vmem:[#allocation2 + $0x10] sm:$0xff] }
 0x157   : > { %v1190_v51 = vpack.c.bf16 %v995_v27, %v994_v30 }
 0x158   : > { %v834_v17 = vpop.permute.xlu1 %833  ;;  %v829_v12 = vpop.permute.xlu0 %828 }
 0x159   : > { %v979_v19 = vmul.f32 %v834_v17, %v755_v6  ;;  %v978_v52 = vmul.f32 %v829_v12, %v754_v59  ;;  %2025 = vmatprep.subr.bf16.mxu0 %v1190_v51  ;;  %2179 = vmatprep.subr.bf16.mxu1 %v1190_v51  ;;  %v1168_v59 = vld [vmem:[#allocation2 + $0x18] sm:$0xff] }
 0x15b   : > { %v1182_v23 = vpack.c.bf16 %v979_v19, %v978_v52  ;;  %v1169_v19 = vld [vmem:[#allocation2 + $0x50] sm:$0xff] }
 0x15c   : > { %v904_v34 = vpop.permute.xlu1 %903  ;;  %v899_v57 = vpop.permute.xlu0 %898 }
 0x15d   : > { %v993_v11 = vmul.f32 %v904_v34, %v769_v31  ;;  %v992_v62 = vmul.f32 %v899_v57, %v768_v15  ;;  %2026 = vmatpush3.bf16.msra.mxu0 %v1182_v23  ;;  %2187 = vmatpush3.bf16.msra.mxu1 %v1182_v23  ;;  %v1177_v15 = vld [vmem:[#allocation2 + $0x60] sm:$0xff] }
 0x15f   : > { %v1189_v21 = vpack.c.bf16 %v993_v11, %v992_v62 }
 0x160   : > { %v824_v16 = vpop.permute.xlu1 %823  ;;  %v819_v0 = vpop.permute.xlu0 %818 }
 0x161   : > { %v977_v25 = vmul.f32 %v824_v16, %v753_v44  ;;  %v976_v22 = vmul.f32 %v819_v0, %v752_v63  ;;  %2027 = vmatprep.subr.bf16.mxu0 %v1189_v21  ;;  %2180 = vmatprep.subr.bf16.mxu1 %v1189_v21  ;;  %v1170_v63 = vld [vmem:[#allocation2 + $0x68] sm:$0xff]  ;;  %v1178_v16 = vld [vmem:[#allocation2 + $0x70] sm:$0xff] }
 0x163   : > { %v1181_v42 = vpack.c.bf16 %v977_v25, %v976_v22 }
 0x165   : > { %2028 = vmatpush3.bf16.msra.mxu0 %v1181_v42  ;;  %2188 = vmatpush3.bf16.msra.mxu1 %v1181_v42 }
 0x168   : > { %1958 = vmatmul.mubr.msk.bf16.vlgmr.msra.gmra.mxu0 %vm2994_vm6, %v3593_v24  ;;  %1974 = vmatmul.mubr.msk.bf16.vlgmr.msra.gmra.mxu1 %vm3013_vm11, %v3593_v24  ;;  %vm3594_vm6 = vnez %v3578_v49  ;;  %vm3595_vm11 = vnez %v3576_v29  ;;  %v1173_v49 = vld [vmem:[#allocation2 + $0x40] sm:$0xff] }
 0x169   : > { %1960 = vmatprep.mubr.msk.bf16.mxu0 %vm3027_vm0, %v3593_v24  ;;  %1976 = vmatprep.mubr.msk.bf16.mxu1 %vm3045_vm7, %v3593_v24  ;;  %vm3596_vm0 = vnez %v3580_v50 }
 0x170   : > { %1962 = vmatmul.mubr.msk.bf16.gmra.mxu0 %vm3039_vm4, %v3593_v24  ;;  %1978 = vmatmul.mubr.msk.bf16.gmra.mxu1 %vm3055_vm10, %v3593_v24 }
 0x171   : > { %1964 = vmatprep.mubr.msk.bf16.mxu0 %vm3069_vm14, %v3593_v24  ;;  %1980 = vmatprep.mubr.msk.bf16.mxu1 %vm3594_vm6, %v3593_v24 }
 0x178   : > { %1966 = vmatmul.mubr.msk.bf16.gmra.mxu0 %vm3595_vm11, %v3593_v24  ;;  %1982 = vmatmul.mubr.msk.bf16.gmra.mxu1 %vm3596_vm0, %v3593_v24 }
 0x179   : > { %1968 = vmatprep.mubr.msk.bf16.mxu0 %vm3113_vm1, %v3593_v24  ;;  %1984 = vmatprep.mubr.msk.bf16.mxu1 %vm3130_vm13, %v3593_v24 }
 0x180   : > { %1970 = vmatmul.mubr.msk.bf16.gmra.mxu0 %vm3124_vm15, %v3593_v24  ;;  %1986 = vmatmul.mubr.msk.bf16.gmra.mxu1 %vm3140_vm2, %v3593_v24 }
 0x228   : > { %v2029_v7 = vpop.f32.mrf.mxu0  ;;  %v2053_v14 = vpop.f32.mrf.mxu1 }
 0x22a   : > { %v2030_v29 = vpop.f32.mrf.mxu0  ;;  %v2054_v50 = vpop.f32.mrf.mxu1 }
 0x22b   : > { %v2031_v38 = vadd.f32 %v2030_v29, %v2029_v7  ;;  %v2055_v33 = vadd.f32 %v2054_v50, %v2053_v14  ;;  %v1179_v7 = vld [vmem:[#allocation2 + $0x78] sm:$0xff] }
 0x22c   : > { %v2032_v4 = vpop.f32.mrf.mxu0  ;;  %v2056_v9 = vpop.f32.mrf.mxu1 }
 0x22d   : > { %v1294_v36 = vadd.f32 %v2031_v38, %v1165_v20  ;;  %v1302_v3 = vadd.f32 %v2055_v33, %v1173_v49 }
 0x22e   : > { %v2033_v8 = vpop.f32.mrf.mxu0  ;;  %v2057_v56 = vpop.f32.mrf.mxu1 }
 0x22f   : > { %1310 = vst [vmem:[#allocation2 + $0x30] sm:$0xff] %v1294_v36  ;;  %1318 = vst [vmem:[#allocation2 + $0x40] sm:$0xff] %v1302_v3  ;;  %v2034_v28 = vadd.f32 %v2033_v8, %v2032_v4  ;;  %v2058_v35 = vadd.f32 %v2057_v56, %v2056_v9  ;;  %v1172_v4 = vld [vmem:[#allocation2 + $0x48] sm:$0xff] }
 0x230   : > { %v2035_v53 = vpop.f32.mrf.mxu0  ;;  %v2059_v32 = vpop.f32.mrf.mxu1  ;;  %v1180_v36 = vld [vmem:[#allocation2 + $0x28] sm:$0xff] }
 0x231   : > { %v1295_v55 = vadd.f32 %v2034_v28, %v1166_v43  ;;  %v1303_v61 = vadd.f32 %v2058_v35, %v1174_v54 }
 0x232   : > { %v2036_v39 = vpop.f32.mrf.mxu0  ;;  %v2060_v6 = vpop.f32.mrf.mxu1 }
 0x233   : > { %1311 = vst [vmem:[#allocation2] sm:$0xff] %v1295_v55  ;;  %1319 = vst [vmem:[#allocation2 + $0x20] sm:$0xff] %v1303_v61  ;;  %v2037_v45 = vadd.f32 %v2036_v39, %v2035_v53  ;;  %v2061_v13 = vadd.f32 %v2060_v6, %v2059_v32 }
 0x234   : > { %v2038_v26 = vpop.f32.mrf.mxu0  ;;  %v2062_v37 = vpop.f32.mrf.mxu1 }
 0x235   : > { %v1296_v27 = vadd.f32 %v2037_v45, %v1167_v48  ;;  %v1304_v30 = vadd.f32 %v2061_v13, %v1175_v46 }
 0x236   : > { %v2039_v10 = vpop.f32.mrf.mxu0  ;;  %v2063_v51 = vpop.f32.mrf.mxu1 }
 0x237   : > { %1312 = vst [vmem:[#allocation2 + $0x58] sm:$0xff] %v1296_v27  ;;  %1320 = vst [vmem:[#allocation2 + $0x10] sm:$0xff] %v1304_v30  ;;  %v2040_v17 = vadd.f32 %v2039_v10, %v2038_v26  ;;  %v2064_v12 = vadd.f32 %v2063_v51, %v2062_v37 }
 0x238   : > { %v2041_v31 = vpop.f32.mrf.mxu0  ;;  %v2065_v60 = vpop.f32.mrf.mxu1 }
 0x239   : > { %v1297_v41 = vadd.f32 %v2040_v17, %v1168_v59  ;;  %v1305_v2 = vadd.f32 %v2064_v12, %v1176_v40 }
 0x23a   : > { %v2042_v52 = vpop.f32.mrf.mxu0  ;;  %v2066_v18 = vpop.f32.mrf.mxu1 }
 0x23b   : > { %1313 = vst [vmem:[#allocation2 + $0x18] sm:$0xff] %v1297_v41  ;;  %1321 = vst [vmem:[#allocation2 + $0x38] sm:$0xff] %v1305_v2  ;;  %v2043_v23 = vadd.f32 %v2042_v52, %v2041_v31  ;;  %v2067_v34 = vadd.f32 %v2066_v18, %v2065_v60 }
 0x23c   : > { %v2044_v57 = vpop.f32.mrf.mxu0  ;;  %v2068_v44 = vpop.f32.mrf.mxu1 }
 0x23d   : > { %v1298_v11 = vadd.f32 %v2043_v23, %v1169_v19  ;;  %v1306_v62 = vadd.f32 %v2067_v34, %v1177_v15 }
 0x23e   : > { %v2045_v21 = vpop.f32.mrf.mxu0  ;;  %v2069_v0 = vpop.f32.mrf.mxu1 }
 0x23f   : > { %1314 = vst [vmem:[#allocation2 + $0x50] sm:$0xff] %v1298_v11  ;;  %1322 = vst [vmem:[#allocation2 + $0x60] sm:$0xff] %v1306_v62  ;;  %v2046_v25 = vadd.f32 %v2045_v21, %v2044_v57  ;;  %v2070_v22 = vadd.f32 %v2069_v0, %v2068_v44 }
 0x240   : > { %v2047_v42 = vpop.f32.mrf.mxu0  ;;  %v2071_v24 = vpop.f32.mrf.mxu1 }
 0x241   : > { %v1299_v47 = vadd.f32 %v2046_v25, %v1170_v63  ;;  %v1307_v58 = vadd.f32 %v2070_v22, %v1178_v16 }
 0x242   : > { %v2048_v5 = vpop.f32.mrf.mxu0  ;;  %v2072_v14 = vpop.f32.mrf.mxu1 }
 0x243   : > { %1315 = vst [vmem:[#allocation2 + $0x68] sm:$0xff] %v1299_v47  ;;  %1323 = vst [vmem:[#allocation2 + $0x70] sm:$0xff] %v1307_v58  ;;  %v2049_v20 = vadd.f32 %v2048_v5, %v2047_v42  ;;  %v2073_v29 = vadd.f32 %v2072_v14, %v2071_v24 }
 0x244   : > { %v2050_v49 = vpop.f32.mrf.mxu0  ;;  %v2074_v50 = vpop.f32.mrf.mxu1 }
 0x245   : > { %v1300_v38 = vadd.f32 %v2049_v20, %v1171_v1  ;;  %v1308_v33 = vadd.f32 %v2073_v29, %v1179_v7 }
 0x246   : > { %v2051_v9 = vpop.f32.mrf.mxu0  ;;  %v2075_v3 = vpop.f32.mrf.mxu1 }
 0x247   : > { %1316 = vst [vmem:[#allocation2 + $0x8] sm:$0xff] %v1300_v38  ;;  %1324 = vst [vmem:[#allocation2 + $0x78] sm:$0xff] %v1308_v33  ;;  %v2052_v43 = vadd.f32 %v2051_v9, %v2050_v49  ;;  %v2076_v8 = vadd.f32 %v2075_v3, %v2074_v50  ;;  %1330 = sbr.rel (%p1987_p5) target bundleno = 1053 (0x41d), region = 72 }
 0x249   : > { %v1301_v54 = vadd.f32 %v2052_v43, %v1172_v4  ;;  %v1309_v56 = vadd.f32 %v2076_v8, %v1180_v36 }
 0x24b   : > { %1317 = vst [vmem:[#allocation2 + $0x48] sm:$0xff] %v1301_v54  ;;  %1325 = vst [vmem:[#allocation2 + $0x28] sm:$0xff] %v1309_v56 }
 0x24c   : > { %v2364_v28 = vld [vmem:[#allocation10 + $0x38] sm:$0xff]   ;;  %v2365_v35 = vld [vmem:[#allocation10 + $0x30] sm:$0xff]   ;;  %v2366_v53 = vld [vmem:[#allocation10 + $0x28] sm:$0xff]  }
 0x24d   : > { %2109 = vmatprep.subr.bf16.mxu0 %v2364_v28  ;;  %v2367_v32 = vld [vmem:[#allocation10 + $0x20] sm:$0xff]   ;;  %v1332_v61 = vld [vmem:[%s2824_s20 + $0x8] sm:$0xff]  ;;  %v1347_v48 = vld [vmem:[#allocation2 + $0x30] sm:$0xff] }
 0x24e   : > { %2110 = vmatpush3.bf16.msra.mxu0 %v2364_v28  ;;  %v1331_v55 = vld [vmem:[%s2824_s20] sm:$0xff]  ;;  %v2368_v45 = vld [vmem:[#allocation10 + $0x18] sm:$0xff]   ;;  %v2369_v26 = vld [vmem:[#allocation10 + $0x10] sm:$0xff]  }
 0x24f   : > { %2111 = vmatprep.subr.bf16.mxu0 %v2365_v35  ;;  %v1348_v39 = vld [vmem:[#allocation2] sm:$0xff]  ;;  %v1363_v46 = vadd.f32 %v1347_v48, %v1331_v55  ;;  %v2370_v37 = vld [vmem:[#allocation10 + $0x8] sm:$0xff]   ;;  %v2372_v27 = vld [vmem:[#allocation12 + $0x38] sm:$0xff]  }
 0x250   : > { %v1364_v6 = vadd.f32 %v1348_v39, %v1332_v61  ;;  %v2373_v30 = vld [vmem:[#allocation12 + $0x30] sm:$0xff]   ;;  %v1334_v10 = vld [vmem:[%s2824_s20 + $0x18] sm:$0xff]  ;;  %2141 = vmatprep.subr.bf16.mxu1 %v2372_v27  ;;  %v2371_v17 = vld [vmem:[#allocation10] sm:$0xff]  }
 0x251   : > { %v1333_v59 = vld [vmem:[%s2824_s20 + $0x10] sm:$0xff]  ;;  %v1349_v40 = vld [vmem:[#allocation2 + $0x58] sm:$0xff]  ;;  %v1335_v12 = vld [vmem:[%s2824_s20 + $0x20] sm:$0xff]  ;;  %2142 = vmatpush3.bf16.msra.mxu1 %v2372_v27 }
 0x252   : > { %2112 = vmatpush3.bf16.msra.mxu0 %v2365_v35  ;;  %v1379_v13 = vpack.c.bf16 %v1364_v6, %v1363_v46  ;;  %v1350_v51 = vld [vmem:[#allocation2 + $0x18] sm:$0xff]  ;;  %v1336_v31 = vld [vmem:[%s2824_s20 + $0x28] sm:$0xff]  ;;  %v1351_v60 = vld [vmem:[#allocation2 + $0x50] sm:$0xff]  ;;  %2143 = vmatprep.subr.bf16.mxu1 %v2373_v30  ;;  %v1365_v19 = vadd.f32 %v1349_v40, %v1333_v59 }
 0x253   : > { %2113 = vmatprep.subr.bf16.mxu0 %v2366_v53  ;;  %v1352_v41 = vld [vmem:[#allocation2 + $0x68] sm:$0xff]  ;;  %v1366_v52 = vadd.f32 %v1350_v51, %v1334_v10  ;;  %v1367_v15 = vadd.f32 %v1351_v60, %v1335_v12  ;;  %v2375_v23 = vld [vmem:[#allocation12 + $0x20] sm:$0xff]   ;;  %v1337_v57 = vld [vmem:[%s2824_s20 + $0x30] sm:$0xff] }
 0x254   : > { %2125 = vmatprep.mubr.bf16.mxu0 %v1379_v13  ;;  %v2374_v2 = vld [vmem:[#allocation12 + $0x28] sm:$0xff]   ;;  %v1368_v18 = vadd.f32 %v1352_v41, %v1336_v31  ;;  %v1338_v44 = vld [vmem:[%s2824_s20 + $0x38] sm:$0xff]  ;;  %v1339_v21 = vld [vmem:[%s2824_s20 + $0x40] sm:$0xff] }
 0x255   : > { %2144 = vmatpush3.bf16.msra.mxu1 %v2373_v30  ;;  %v1380_v34 = vpack.c.bf16 %v1366_v52, %v1365_v19  ;;  %v1353_v11 = vld [vmem:[#allocation2 + $0x8] sm:$0xff]  ;;  %v2376_v16 = vld [vmem:[#allocation12 + $0x18] sm:$0xff]   ;;  %v1355_v25 = vld [vmem:[#allocation2 + $0x40] sm:$0xff] }
 0x256   : > { %2114 = vmatpush3.bf16.msra.mxu0 %v2366_v53  ;;  %2145 = vmatprep.subr.bf16.mxu1 %v2374_v2  ;;  %v1381_v62 = vpack.c.bf16 %v1368_v18, %v1367_v15  ;;  %v1354_v63 = vld [vmem:[#allocation2 + $0x48] sm:$0xff]  ;;  %v1356_v22 = vld [vmem:[#allocation2 + $0x20] sm:$0xff]  ;;  %v1369_v42 = vadd.f32 %v1353_v11, %v1337_v57  ;;  %v1371_v47 = vadd.f32 %v1355_v25, %v1339_v21  ;;  %v1341_v5 = vld [vmem:[%s2824_s20 + $0x50] sm:$0xff] }
 0x257   : > { %2115 = vmatprep.subr.bf16.mxu0 %v2367_v32  ;;  %v1340_v0 = vld [vmem:[%s2824_s20 + $0x48] sm:$0xff]  ;;  %v1370_v24 = vadd.f32 %v1354_v63, %v1338_v44  ;;  %v1342_v7 = vld [vmem:[%s2824_s20 + $0x58] sm:$0xff]  ;;  %v1357_v20 = vld [vmem:[#allocation2 + $0x10] sm:$0xff] }
 0x258   : > { %v1372_v58 = vadd.f32 %v1356_v22, %v1340_v0  ;;  %v1358_v29 = vld [vmem:[#allocation2 + $0x38] sm:$0xff]  ;;  %v1343_v49 = vld [vmem:[%s2824_s20 + $0x60] sm:$0xff]  ;;  %v1344_v50 = vld [vmem:[%s2824_s20 + $0x68] sm:$0xff]  ;;  %v1373_v4 = vadd.f32 %v1357_v20, %v1341_v5 }
 0x259   : > { %2146 = vmatpush3.bf16.msra.mxu1 %v2374_v2  ;;  %v1382_v1 = vpack.c.bf16 %v1370_v24, %v1369_v42  ;;  %v1359_v38 = vld [vmem:[#allocation2 + $0x60] sm:$0xff]  ;;  %v1360_v33 = vld [vmem:[#allocation2 + $0x70] sm:$0xff]  ;;  %v1374_v9 = vadd.f32 %v1358_v29, %v1342_v7  ;;  %v1346_v56 = vld [vmem:[%s2824_s20 + $0x78] sm:$0xff] }
 0x25a   : > { %2116 = vmatpush3.bf16.msra.mxu0 %v2367_v32  ;;  %2147 = vmatprep.subr.bf16.mxu1 %v2375_v23  ;;  %v1383_v14 = vpack.c.bf16 %v1372_v58, %v1371_v47  ;;  %v1375_v36 = vadd.f32 %v1359_v38, %v1343_v49  ;;  %v1376_v3 = vadd.f32 %v1360_v33, %v1344_v50  ;;  %v1345_v8 = vld [vmem:[%s2824_s20 + $0x70] sm:$0xff]  ;;  %v1361_v28 = vld [vmem:[#allocation2 + $0x78] sm:$0xff]  ;;  %v1362_v35 = vld [vmem:[#allocation2 + $0x28] sm:$0xff] }
 0x25b   : > { %2117 = vmatprep.subr.bf16.mxu0 %v2368_v45  ;;  %v1384_v43 = vpack.c.bf16 %v1374_v9, %v1373_v4  ;;  %v1377_v53 = vadd.f32 %v1361_v28, %v1345_v8  ;;  %v1378_v32 = vadd.f32 %v1362_v35, %v1346_v56  ;;  %v2377_v61 = vld [vmem:[#allocation12 + $0x10] sm:$0xff]   ;;  %v2378_v48 = vld [vmem:[#allocation12 + $0x8] sm:$0xff]   ;;  %v2379_v39 = vld [vmem:[#allocation12] sm:$0xff]  }
 0x25c   : > { %v1385_v54 = vpack.c.bf16 %v1376_v3, %v1375_v36  ;;  %v1997_v35 = vld [vmem:[%s3524_s10] ss:$0 sm:$0xff] }
 0x25d   : > { %2148 = vmatpush3.bf16.msra.mxu1 %v2375_v23  ;;  %v1386_v55 = vpack.c.bf16 %v1378_v32, %v1377_v53 }
 0x25e   : > { %2118 = vmatpush3.bf16.msra.mxu0 %v2368_v45  ;;  %2149 = vmatprep.subr.bf16.mxu1 %v2376_v16  ;;  %v1988_v45 = vld [vmem:[%s3522_s8] ss:$0 sm:$0xff] }
 0x25f   : > { %2119 = vmatprep.subr.bf16.mxu0 %v2369_v26 }
 0x261   : > { %2150 = vmatpush3.bf16.msra.mxu1 %v2376_v16 }
 0x262   : > { %2120 = vmatpush3.bf16.msra.mxu0 %v2369_v26  ;;  %2151 = vmatprep.subr.bf16.mxu1 %v2377_v61 }
 0x263   : > { %2121 = vmatprep.subr.bf16.mxu0 %v2370_v37 }
 0x265   : > { %2152 = vmatpush3.bf16.msra.mxu1 %v2377_v61 }
 0x266   : > { %2122 = vmatpush3.bf16.msra.mxu0 %v2370_v37  ;;  %2153 = vmatprep.subr.bf16.mxu1 %v2378_v48 }
 0x267   : > { %2123 = vmatprep.subr.bf16.mxu0 %v2371_v17 }
 0x269   : > { %2154 = vmatpush3.bf16.msra.mxu1 %v2378_v48 }
 0x26a   : > { %2124 = vmatpush3.bf16.msra.mxu0 %v2371_v17  ;;  %2155 = vmatprep.subr.bf16.mxu1 %v2379_v39 }
 0x26d   : > { %2126 = vmatmul.mubr.bf16.vlgmr.msra.gmra.mxu0 %v1380_v34  ;;  %2156 = vmatpush3.bf16.msra.mxu1 %v2379_v39 }
 0x26e   : > { %2129 = vmatprep.mubr.bf16.mxu0 %v1381_v62 }
 0x275   : > { %2130 = vmatmul.mubr.bf16.gmra.mxu0 %v1382_v1 }
 0x276   : > { %2133 = vmatprep.mubr.bf16.mxu0 %v1383_v14 }
 0x27d   : > { %2134 = vmatmul.mubr.bf16.gmra.mxu0 %v1384_v43 }
 0x27e   : > { %2137 = vmatprep.mubr.bf16.mxu0 %v1385_v54 }
 0x285   : > { %2138 = vmatmul.mubr.bf16.gmra.mxu0 %v1386_v55 }
 0x32d   : > { %v2127_v46 = vpop.f32.mrf.mxu0 }
 0x32e   : > { %v1501_v27 = vadd.f32 %v2127_v46, %v1988_v45 }
 0x32f   : > { %v1492_v6 = vpop.f32.mrf.mxu0 }
 0x330   : > { %v1493_v26 = vadd.f32 %v1988_v45, %v1492_v6  ;;  %v1557_v12 = vmax.f32 %v1501_v27, 0.0 }
 0x331   : > { %v2128_v13 = vpop.f32.mrf.mxu0 }
 0x332   : > { %v1504_v37 = vadd.f32 %v2128_v13, %v1988_v45  ;;  %v1555_v51 = vmax.f32 %v1493_v26, 0.0 }
 0x333   : > { %v1495_v30 = vpop.f32.mrf.mxu0 }
 0x334   : > { %v1496_v59 = vadd.f32 %v1988_v45, %v1495_v30  ;;  %v1558_v10 = vmax.f32 %v1504_v37, 0.0 }
 0x335   : > { %v2131_v40 = vpop.f32.mrf.mxu0 }
 0x336   : > { %v1556_v17 = vmax.f32 %v1496_v59, 0.0  ;;  %v1572_v41 = vpack.c.bf16 %v1558_v10, %v1557_v12  ;;  %v1517_v15 = vadd.f32 %v2131_v40, %v1988_v45 }
 0x337   : > { %v1508_v31 = vpop.f32.mrf.mxu0 }
 0x338   : > { %v1571_v60 = vpack.c.bf16 %v1556_v17, %v1555_v51  ;;  %v1509_v19 = vadd.f32 %v1988_v45, %v1508_v31  ;;  %v1561_v62 = vmax.f32 %v1517_v15, 0.0 }
 0x339   : > { %v2132_v2 = vpop.f32.mrf.mxu0 }
 0x33a   : > { %v1520_v52 = vadd.f32 %v2132_v2, %v1988_v45  ;;  %2157 = vmatprep.mubr.bf16.mxu1 %v1571_v60  ;;  %v1559_v44 = vmax.f32 %v1509_v19, 0.0 }
 0x33b   : > { %v1511_v18 = vpop.f32.mrf.mxu0  ;;  %2158 = vmatmul.mubr.bf16.vlgmr.msra.gmra.mxu1 %v1572_v41 }
 0x33c   : > { %v1512_v23 = vadd.f32 %v1988_v45, %v1511_v18  ;;  %v1562_v34 = vmax.f32 %v1520_v52, 0.0 }
 0x33d   : > { %v2135_v57 = vpop.f32.mrf.mxu0 }
 0x33e   : > { %v1560_v11 = vmax.f32 %v1512_v23, 0.0  ;;  %v1574_v16 = vpack.c.bf16 %v1562_v34, %v1561_v62  ;;  %v1533_v42 = vadd.f32 %v2135_v57, %v1988_v45 }
 0x33f   : > { %v1524_v63 = vpop.f32.mrf.mxu0 }
 0x340   : > { %v1573_v21 = vpack.c.bf16 %v1560_v11, %v1559_v44  ;;  %v1525_v25 = vadd.f32 %v1988_v45, %v1524_v63  ;;  %v1565_v14 = vmax.f32 %v1533_v42, 0.0 }
 0x341   : > { %v2136_v0 = vpop.f32.mrf.mxu0 }
 0x342   : > { %v1536_v22 = vadd.f32 %v2136_v0, %v1988_v45  ;;  %2161 = vmatprep.mubr.bf16.mxu1 %v1573_v21  ;;  %v1563_v5 = vmax.f32 %v1525_v25, 0.0 }
 0x343   : > { %v1527_v24 = vpop.f32.mrf.mxu0  ;;  %2162 = vmatmul.mubr.bf16.gmra.mxu1 %v1574_v16 }
 0x344   : > { %v1528_v47 = vadd.f32 %v1988_v45, %v1527_v24  ;;  %v1566_v58 = vmax.f32 %v1536_v22, 0.0 }
 0x345   : > { %v2139_v1 = vpop.f32.mrf.mxu0 }
 0x346   : > { %v1564_v7 = vmax.f32 %v1528_v47, 0.0  ;;  %v1576_v49 = vpack.c.bf16 %v1566_v58, %v1565_v14  ;;  %v1549_v4 = vadd.f32 %v2139_v1, %v1988_v45 }
 0x347   : > { %v1540_v20 = vpop.f32.mrf.mxu0 }
 0x348   : > { %v1575_v29 = vpack.c.bf16 %v1564_v7, %v1563_v5  ;;  %v1541_v38 = vadd.f32 %v1988_v45, %v1540_v20  ;;  %v1569_v54 = vmax.f32 %v1549_v4, 0.0 }
 0x349   : > { %v2140_v50 = vpop.f32.mrf.mxu0 }
 0x34a   : > { %v1552_v33 = vadd.f32 %v2140_v50, %v1988_v45  ;;  %2165 = vmatprep.mubr.bf16.mxu1 %v1575_v29  ;;  %v1567_v43 = vmax.f32 %v1541_v38, 0.0 }
 0x34b   : > { %v1543_v9 = vpop.f32.mrf.mxu0  ;;  %2166 = vmatmul.mubr.bf16.gmra.mxu1 %v1576_v49 }
 0x34c   : > { %v1544_v36 = vadd.f32 %v1988_v45, %v1543_v9  ;;  %v1570_v3 = vmax.f32 %v1552_v33, 0.0 }
 0x34e   : > { %v1568_v8 = vmax.f32 %v1544_v36, 0.0  ;;  %v1578_v28 = vpack.c.bf16 %v1570_v3, %v1569_v54 }
 0x350   : > { %v1577_v56 = vpack.c.bf16 %v1568_v8, %v1567_v43 }
 0x352   : > { %2169 = vmatprep.mubr.bf16.mxu1 %v1577_v56 }
 0x353   : > { %2170 = vmatmul.mubr.bf16.gmra.mxu1 %v1578_v28 }
 0x3fb   : > { %v2159_v53 = vpop.f32.mrf.mxu1 }
 0x3fc   : > { %v1693_v32 = vadd.f32 %v2159_v53, %v1997_v35 }
 0x3fd   : > { %v1684_v55 = vpop.f32.mrf.mxu1 }
 0x3fe   : > { %1749 = vst [vmem:[%s2856_s19 + $0x10] sm:$0xff] %v1693_v32  ;;  %v1685_v61 = vadd.f32 %v1997_v35, %v1684_v55 }
 0x3ff   : > { %v2160_v48 = vpop.f32.mrf.mxu1 }
 0x400   : > { %1747 = vst [vmem:[%s2856_s19] sm:$0xff] %v1685_v61  ;;  %v1696_v39 = vadd.f32 %v2160_v48, %v1997_v35 }
 0x401   : > { %v1687_v46 = vpop.f32.mrf.mxu1 }
 0x402   : > { %1750 = vst [vmem:[%s2856_s19 + $0x18] sm:$0xff] %v1696_v39  ;;  %v1688_v6 = vadd.f32 %v1997_v35, %v1687_v46 }
 0x403   : > { %v2163_v45 = vpop.f32.mrf.mxu1 }
 0x404   : > { %1748 = vst [vmem:[%s2856_s19 + $0x8] sm:$0xff] %v1688_v6  ;;  %v1709_v13 = vadd.f32 %v2163_v45, %v1997_v35 }
 0x405   : > { %v1700_v26 = vpop.f32.mrf.mxu1 }
 0x406   : > { %1753 = vst [vmem:[%s2856_s19 + $0x30] sm:$0xff] %v1709_v13  ;;  %v1701_v37 = vadd.f32 %v1997_v35, %v1700_v26 }
 0x407   : > { %v2164_v27 = vpop.f32.mrf.mxu1 }
 0x408   : > { %1751 = vst [vmem:[%s2856_s19 + $0x20] sm:$0xff] %v1701_v37  ;;  %v1712_v30 = vadd.f32 %v2164_v27, %v1997_v35 }
 0x409   : > { %v1703_v59 = vpop.f32.mrf.mxu1 }
 0x40a   : > { %1754 = vst [vmem:[%s2856_s19 + $0x38] sm:$0xff] %v1712_v30  ;;  %v1704_v10 = vadd.f32 %v1997_v35, %v1703_v59 }
 0x40b   : > { %v2167_v40 = vpop.f32.mrf.mxu1 }
 0x40c   : > { %1752 = vst [vmem:[%s2856_s19 + $0x28] sm:$0xff] %v1704_v10  ;;  %v1725_v51 = vadd.f32 %v2167_v40, %v1997_v35 }
 0x40d   : > { %v1716_v17 = vpop.f32.mrf.mxu1 }
 0x40e   : > { %1757 = vst [vmem:[%s2856_s19 + $0x50] sm:$0xff] %v1725_v51  ;;  %v1717_v12 = vadd.f32 %v1997_v35, %v1716_v17 }
 0x40f   : > { %v2168_v31 = vpop.f32.mrf.mxu1 }
 0x410   : > { %1755 = vst [vmem:[%s2856_s19 + $0x40] sm:$0xff] %v1717_v12  ;;  %v1728_v60 = vadd.f32 %v2168_v31, %v1997_v35 }
 0x411   : > { %v1719_v41 = vpop.f32.mrf.mxu1 }
 0x412   : > { %1758 = vst [vmem:[%s2856_s19 + $0x58] sm:$0xff] %v1728_v60  ;;  %v1720_v2 = vadd.f32 %v1997_v35, %v1719_v41 }
 0x413   : > { %v2171_v19 = vpop.f32.mrf.mxu1 }
 0x414   : > { %1756 = vst [vmem:[%s2856_s19 + $0x48] sm:$0xff] %v1720_v2  ;;  %v1741_v52 = vadd.f32 %v2171_v19, %v1997_v35 }
 0x415   : > { %v1732_v15 = vpop.f32.mrf.mxu1 }
 0x416   : > { %1761 = vst [vmem:[%s2856_s19 + $0x70] sm:$0xff] %v1741_v52  ;;  %v1733_v18 = vadd.f32 %v1997_v35, %v1732_v15 }
 0x417   : > { %v2172_v23 = vpop.f32.mrf.mxu1 }
 0x418   : > { %1759 = vst [vmem:[%s2856_s19 + $0x60] sm:$0xff] %v1733_v18  ;;  %v1744_v34 = vadd.f32 %v2172_v23, %v1997_v35 }
 0x419   : > { %v1735_v57 = vpop.f32.mrf.mxu1 }
 0x41a   : > { %1762 = vst [vmem:[%s2856_s19 + $0x78] sm:$0xff] %v1744_v34  ;;  %v1736_v44 = vadd.f32 %v1997_v35, %v1735_v57 }
 0x41c   : > { %1760 = vst [vmem:[%s2856_s19 + $0x68] sm:$0xff] %v1736_v44 }
 0x41d PF: > { %p3601_p13 = scmp.ne.s32.totalorder %s3548_s24, 0  ;;  %s1778_s25 = sshll.u32 %s2856_s19, 4  ;;  %s3457_s25 = int_to_ptr.vmem [resolvable:$true] %s1778_s25 }
 0x41e   : > { %s3602_s13 = sand.u32 1, %s2570_s2   ;;  %s2496_s23 = scalar_lea.vmem %s3457_s25, 2048 }
 0x41f   : > { %s2201_s27 = scalar_select %p3601_p13, [#allocation4], [#allocation15] }
 0x420   : > { %s3623_s17 = smov (!%p3601_p13, %s2711_s17), 0  ;;  %s3466_s26 = scalar_lea.sflag [#allocation9], %s3602_s13 }
 0x421   : > { %s1771_s22 = sld [smem:[%s2201_s27 + %s3623_s17]]  ;;  %p2497_p0 = scmp.ne.s32.totalorder %s3457_s25, %s2496_s23 }
 0x422   : > { %s2605_s17 = smov [#allocation13]  }
 0x423   : > { %p2498_p11 = pnand %p2497_p0, %p3601_p13  ;;  %s2500_s19 = sshll.u32 %s2605_s17, 4  ;;  %s2501_s19 = int_to_ptr.vmem [resolvable:$false] %s2500_s19 }
 0x424   : > { %s2502_s29 = scalar_lea.vmem %s2501_s19, 4096  ;;  %p2503_p1 = scmp.lt.s32.totalorder %s3457_s25, %s2501_s19 }
 0x425   : > { %p2499_p9 = pneg %p2498_p11  ;;  %p2504_p8 = scmp.lt.s32.totalorder %s2502_s29, %s2496_s23 }
 0x427   : > { %s2012_s0 = sshll.u32 %s1771_s22, 11  ;;  %p2505_p7 = por %p2504_p8, %p2503_p1 }
 0x428   : > { %s3462_s1 = scalar_lea.hbm %s3525_s11, %s2012_s0 }
 0x429   : > { %p2506_p2 = pnand %p2505_p7, %p2499_p9 }
 0x42b   : > { %2509 = shalt.err (!%p2506_p2)
}
 0x42c   : > { %s2510_s20 = scalar_lea.hbm %s3462_s1, 2048  ;;  %s2514_s28 = scalar_lea.hbm %s3525_s11, 2048 }
 0x42d   : > { %p2511_p3 = scmp.ne.s32.totalorder %s3462_s1, %s2510_s20  ;;  %p2515_p6 = scmp.lt.s32.totalorder %s3462_s1, %s3525_s11 }
 0x42e   : > { %p2516_p10 = scmp.lt.s32.totalorder %s2514_s28, %s2510_s20 }
 0x42f   : > { %p2512_p12 = pnand %p2511_p3, %p3601_p13 }
 0x430   : > { %p2517_p5 = por %p2516_p10, %p2515_p6 }
 0x431   : > { %p2513_p4 = pneg %p2512_p12 }
 0x433   : > { %p2518_p0 = pnand %p2517_p5, %p2513_p4 }
 0x435   : > { %2521 = shalt.err (!%p2518_p0)
}
 0x436   : > { %s2606_s0 = smov 128   ;;  %s2607_s21 = smov 8  }
 0x437   : > { %2203 = dma.vmem_to_hbm [thread:$0]  (%p3601_p13), %s3457_s25, 2048, %s3462_s1, %s3466_s26, %s2606_s0, %s2606_s0, %s2607_s21  }
 0x438 PF: > { %s3603_s18 = sld [smem:[#allocation23_spill]]  ;;  %s1793_s13 = sand.u32 1, %s2566_s30  }
 0x439   : > { %p3605_p9 = scmp.ge.s32.totalorder %s2590_s16, 2  ;;  %s1794_s23 = scalar_lea.sflag [#allocation9], %s1793_s13 }
 0x43e   : > { %p3604_p11 = scmp.ne.s32.totalorder %s3603_s18, 0 }
 0x440   : > { %p2219_p1 = pnand %p3605_p9, %p3604_p11 }
 0x442   : > { %p2220_p8 = pneg %p2219_p1 }
 0x444   : > { %2561 = dma.done.wait (%p2220_p8), %s1794_s23, 2048  }
 0x445   : > { %2563 = vsyncadd (%p2220_p8), %s1794_s23, 4294965248  ;;  %s3606_s16 = sld [smem:[#allocation22_spill]]  ;;  %s3609_s30 = smov %s2570_s2 }
 0x446   : > { %s3607_s17 = sld [smem:[#allocation21_spill]]  ;;  %s3611_s13 = smov %s2582_s14 }
 0x447   : > { %s3608_s12 = sld [smem:[#allocation24_spill]]  ;;  %s3612_s14 = smov %s2586_s15 }
 0x448   : > { %s3613_s15 = smov %s2790_s7 }
 0x44b   : > { %p39_p13 = scmp.ge.s32.totalorder %s3606_s16, 4  }
 0x44c   : > { %s3610_s2 = smov %s3607_s17 }
 0x44d   :  { %41 = sbr.rel (!%p39_p13) target bundleno = 44 (0x2c), region = 122 }
 0x452   :  { %1799 = vsyncpa [#allocation8], 1 }
 0x453   :  { %1801 = vsyncpa [#allocation8 + $0x1], 1 }
 0x454   :  { %1802 = vsyncpa [#allocation11], 1 }
 0x455   :  { %1803 = vsyncpa [#allocation9], 1 }
 0x456   :  { %1805 = vsyncpa [#allocation9 + $0x1], 1 }

</bundles_post_ra>
